<compile_context>
chip_gen: v7x
topology: tpu7x:2x2x1
jax: 0.10.0
libtpu: 0.0.40
codegen_flags: <defaults>
</compile_context>

<pallas_src>
import functools
import math

import jax
import jax.numpy as jnp
from jax.experimental import pallas as pl
from jax.experimental.pallas import tpu as pltpu


def _round_up(n, m):
    return ((n + m - 1) // m) * m


def _apply_activation(x, name):
    if name == "tanh":
        return jnp.tanh(x)
    if name == "relu":
        return jnp.maximum(x, 0.0)
    if name == "sigmoid":
        return jax.nn.sigmoid(x)
    if name == "identity":
        return x
    raise ValueError(f"unsupported activation: {name}")


def _fused_mlp_kernel(x_ref, *refs, activations):
    """Fused ensemble-MLP forward for one batch tile.

    x_ref : (E, TB, F0)  activation input tile (native dtype; cast once below)
    refs  : (w0, b0, w1, b1, ..., wL, bL, o_ref)
            w_l : (E, Fin_l, Fout_l)   already in the matmul dtype (e.g. bf16)
            b_l : (E, 1, Fout_l)       already f32
    o_ref : (E, TB, Fout_last)         lane-dense (Fout_last % 128 == 0)
    """
    o_ref = refs[-1]
    h = x_ref[...]                                            # (E, TB, F0)
    for l, act in enumerate(activations):
        w = refs[2 * l][...]                                  # resident weights
        b = refs[2 * l + 1][...]                              # resident f32 bias
        # One batched MXU matmul over the ensemble axis; single cast of the
        # activations to the (pre-cast) weight dtype, f32 accumulation.
        h = jnp.einsum(
            "ebf,efo->ebo",
            h.astype(w.dtype),
            w,
            preferred_element_type=jnp.float32,
        )
        h = _apply_activation(h + b, act)                     # VPU/EUP in f32
    o_ref[...] = h.astype(o_ref.dtype)


def _choose_batch_tile(B, batch_tile):
    """Largest multiple of 8 <= batch_tile that divides B (avoids padding x);
    falls back to the capped tile (with padding) if none exists."""
    cap = min(batch_tile, _round_up(B, 8))
    cap = max(cap - cap % 8, 8)
    for cand in range(cap, 7, -8):
        if B % cand == 0:
            return cand
    return cap


def ensemble_mlp_forward(x, weights, biases, activations, *,
                         batch_tile=512, matmul_dtype=jnp.bfloat16,
                         lane_multiple=128):
    """Fused ensemble-MLP forward pass.

    x             : (B, E, F0)  -- same layout as the PyTorch module.
    weights[l]    : (E, F_l, F_{l+1})
    biases[l]     : (E, F_{l+1})
    activations[l]: activation after layer l ('tanh'/'relu'/'sigmoid'/'identity').
    Returns (B, E, F_last).
    """
    B, E, F0 = x.shape
    num_layers = len(weights)
    assert len(biases) == num_layers and len(activations) == num_layers
    out_dim = int(weights[-1].shape[-1])
    out_dtype = jnp.promote_types(x.dtype, weights[0].dtype)

    # --- Feature-dim padding: every layer's Fout padded up to lane_multiple.
    # Padded columns are exact zeros; the next layer's padded Fin rows are zero
    # weights, so padded features never contribute to real outputs.
    pws, pbs = [], []
    pad_rows = 0
    for w, b in zip(weights, biases):
        e_, _, fout = w.shape
        fout_p = _round_up(int(fout), lane_multiple)
        w_p = jnp.pad(w, ((0, 0), (0, pad_rows), (0, fout_p - fout)))
        b_p = jnp.pad(b, ((0, 0), (0, fout_p - fout)))
        pws.append(w_p.astype(matmul_dtype))                  # pre-cast once
        pbs.append(b_p.astype(jnp.float32).reshape(e_, 1, fout_p))
        pad_rows = fout_p - fout
    out_pad = int(pws[-1].shape[-1])

    # --- Batch tiling (prefer a tile that divides B so no jnp.pad HBM pass).
    tb = _choose_batch_tile(B, max(int(batch_tile), 8))
    padded_b = _round_up(B, tb)

    # (E, B, F) layout: ensemble is the leading batch dim of the in-kernel matmul.
    # TODO(synk): for very large rollout batches this wrapper-side permute (and
    # the inverse on the output) could be folded into the kernel as a per-tile
    # XLU permute to save one full HBM pass each way.
    xe = jnp.transpose(x, (1, 0, 2))
    if padded_b != B:
        xe = jnp.pad(xe, ((0, 0), (0, padded_b - B), (0, 0)))

    grid = (padded_b // tb,)

    # Advisory cost estimate (padded dims).
    flops = 2 * E * padded_b * sum(int(w.shape[1]) * int(w.shape[2]) for w in pws)
    transcendentals = E * padded_b * sum(
        int(w.shape[2]) for w, a in zip(pws, activations) if a == "tanh")
    bytes_accessed = int(
        xe.size * xe.dtype.itemsize
        + E * padded_b * out_pad * jnp.dtype(out_dtype).itemsize
        + sum(int(w.size) * w.dtype.itemsize for w in pws)
        + sum(int(b.size) * b.dtype.itemsize for b in pbs))

    # Explicit VMEM budget: resident weights/biases + double-buffered tiles +
    # activation temporaries + headroom; >= 32 MiB, capped at 64 MiB (v7x phys).
    weight_bytes = (sum(int(w.size) * w.dtype.itemsize for w in pws)
                    + sum(int(b.size) * b.dtype.itemsize for b in pbs))
    max_feat = max([F0] + [int(w.shape[2]) for w in pws])
    tile_bytes = (2 * tb * E * F0 * xe.dtype.itemsize
                  + 2 * tb * E * out_pad * jnp.dtype(out_dtype).itemsize
                  + 3 * tb * E * max_feat * 4)
    vmem_limit = int(min(max(2 * weight_bytes + tile_bytes + (2 << 20), 32 << 20),
                         64 << 20))

    kernel = functools.partial(_fused_mlp_kernel, activations=tuple(activations))

    operands = [xe]
    for w_p, b_p in zip(pws, pbs):
        operands.append(w_p)
        operands.append(b_p)

    def build(single_buffer_resident):
        # Constant-index (resident) blocks don't need double buffering.
        resident_kwargs = (dict(pipeline_mode=pl.Buffered(1))
                           if single_buffer_resident else {})
        in_specs = [pl.BlockSpec((E, tb, F0), lambda i: (0, i, 0))]
        for w_p, b_p in zip(pws, pbs):
            in_specs.append(pl.BlockSpec(tuple(w_p.shape), lambda i: (0, 0, 0),
                                         **resident_kwargs))
            in_specs.append(pl.BlockSpec(tuple(b_p.shape), lambda i: (0, 0, 0),
                                         **resident_kwargs))
        out_specs = pl.BlockSpec((E, tb, out_pad), lambda i: (0, i, 0))
        return pl.pallas_call(
            kernel,
            out_shape=jax.ShapeDtypeStruct((E, padded_b, out_pad), out_dtype),
            grid=grid,
            in_specs=in_specs,
            out_specs=out_specs,
            compiler_params=pltpu.CompilerParams(
                dimension_semantics=("parallel",),   # batch tiles shard across v7x cores
                vmem_limit_bytes=vmem_limit,
            ),
            cost_estimate=pl.CostEstimate(
                flops=flops,
                transcendentals=transcendentals,
                bytes_accessed=bytes_accessed,
            ),
        )

    try:
        out = build(True)(*operands)
    except Exception:
        # Fallback if single-buffered resident blocks are rejected by this
        # jax/Mosaic version: identical kernel, default double buffering.
        out = build(False)(*operands)

    # Drop batch + lane padding and restore (B, E, out_dim); the slice and the
    # transpose fuse into a single XLA copy.
    return jnp.transpose(out[:, :B, :out_dim], (1, 0, 2))


class EnsembleMLPPallas:
    """JAX/Pallas reimplementation of mbpo_pytorch EnsembleMLP (forward only)."""

    def __init__(self, input_dim, output_dim, hidden_dims, activation="tanh",
                 last_activation="identity", ensemble_size=7, key=None,
                 matmul_dtype=jnp.bfloat16, batch_tile=512):
        self.ensemble_size = ensemble_size
        self.matmul_dtype = matmul_dtype
        self.batch_tile = batch_tile
        key = jax.random.PRNGKey(0) if key is None else key

        def _init_layer(k, fin, fout):
            bound = math.sqrt(1.0 / fin)
            kw, kb = jax.random.split(k)
            w = jax.random.uniform(kw, (ensemble_size, fin, fout),
                                   jnp.float32, -bound, bound)
            b = jax.random.uniform(kb, (ensemble_size, fout),
                                   jnp.float32, -bound, bound)
            return w, b

        sizes = [input_dim] + list(hidden_dims)
        self.weights, self.biases, self.activations = [], [], []
        for i in range(len(sizes) - 1):
            key, sub = jax.random.split(key)
            w, b = _init_layer(sub, sizes[i], sizes[i + 1])
            self.weights.append(w)
            self.biases.append(b)
            self.activations.append(activation)

        key, sub = jax.random.split(key)
        w, b = _init_layer(sub, sizes[-1], output_dim)
        self.weights.append(w)
        self.biases.append(b)
        self.activations.append(last_activation)

    def __call__(self, x):
        # x: (B, E, input_dim), same convention as the PyTorch einsum 'abc,bcd->abd'.
        return ensemble_mlp_forward(x, self.weights, self.biases, self.activations,
                                    batch_tile=self.batch_tile,
                                    matmul_dtype=self.matmul_dtype)


def _reference_forward(model, x):
    # Pure-JAX reference mirroring the PyTorch module exactly:
    #   out = einsum('abc,bcd->abd', x, W) + bias ; activation
    for w, b, act in zip(model.weights, model.biases, model.activations):
        x = jnp.einsum("abc,bcd->abd", x, w) + b
        x = _apply_activation(x, act)
    return x


if __name__ == "__main__":
    ensemble_size = 7
    batch = 8
    input_dim = 4
    hidden_dims = [32, 32]
    output_dim = 4

    key = jax.random.PRNGKey(0)
    key, kx, kp = jax.random.split(key, 3)
    # (batch, ensemble, input_dim) -- the layout the PyTorch einsum expects.
    x = jax.random.normal(kx, (batch, ensemble_size, input_dim), jnp.float32)

    model = EnsembleMLPPallas(input_dim, output_dim, hidden_dims,
                              activation="tanh", last_activation="identity",
                              ensemble_size=ensemble_size, key=kp,
                              matmul_dtype=jnp.bfloat16)

    ref = _reference_forward(model, x)

    # f32 MXU path: tight check against the pure-JAX reference.
    out_f32 = ensemble_mlp_forward(x, model.weights, model.biases,
                                   model.activations,
                                   matmul_dtype=jnp.float32)
    out_f32 = jax.block_until_ready(out_f32)
    assert out_f32.shape == (batch, ensemble_size, output_dim)
    assert jnp.allclose(out_f32, ref, atol=1e-4, rtol=1e-4)

    # Default production path (bf16 MXU operands): looser tolerance vs f32 ref.
    out_bf16 = jax.block_until_ready(model(x))
    assert out_bf16.shape == (batch, ensemble_size, output_dim)
    assert jnp.allclose(out_bf16, ref, atol=1e-1, rtol=5e-2)

    print("KERNEL_OK")
</pallas_src>

<mosaic_0001>
module attributes {stable_mosaic.version = 11 : i64} {
  func.func @_fused_mlp_kernel(%arg0: i32, %arg1: memref<7x8x4xf32, #tpu.memory_space<vmem>>, %arg2: memref<7x4x128xf32, #tpu.memory_space<vmem>>, %arg3: memref<7x1x128xf32, #tpu.memory_space<vmem>>, %arg4: memref<7x128x128xf32, #tpu.memory_space<vmem>>, %arg5: memref<7x1x128xf32, #tpu.memory_space<vmem>>, %arg6: memref<7x128x128xf32, #tpu.memory_space<vmem>>, %arg7: memref<7x1x128xf32, #tpu.memory_space<vmem>>, %arg8: memref<7x8x128xf32, #tpu.memory_space<vmem>>) attributes {dimension_semantics = [#tpu.dimension_semantics<parallel>], iteration_bounds = array<i64: 1>, scalar_prefetch = 0 : i64, scratch_operands = 0 : i64, tpu.core_type = #tpu.core_type<tc>, window_params = [{transform_indices = @transform_0, window_bounds = array<i64: 7, 8, 4>}, {pipeline_mode = #tpu.pipeline_mode<synchronous>, transform_indices = @transform_1, window_bounds = array<i64: 7, 4, 128>}, {pipeline_mode = #tpu.pipeline_mode<synchronous>, transform_indices = @transform_2, window_bounds = array<i64: 7, 1, 128>}, {pipeline_mode = #tpu.pipeline_mode<synchronous>, transform_indices = @transform_3, window_bounds = array<i64: 7, 128, 128>}, {pipeline_mode = #tpu.pipeline_mode<synchronous>, transform_indices = @transform_4, window_bounds = array<i64: 7, 1, 128>}, {pipeline_mode = #tpu.pipeline_mode<synchronous>, transform_indices = @transform_5, window_bounds = array<i64: 7, 128, 128>}, {pipeline_mode = #tpu.pipeline_mode<synchronous>, transform_indices = @transform_6, window_bounds = array<i64: 7, 1, 128>}, {transform_indices = @transform_7, window_bounds = array<i64: 7, 8, 128>}]} {
    %c0 = arith.constant 0 : index
    %c0_0 = arith.constant 0 : index
    %c0_1 = arith.constant 0 : index
    %0 = vector.load %arg1[%c0, %c0_0, %c0_1] : memref<7x8x4xf32, #tpu.memory_space<vmem>>, vector<7x8x4xf32>
    %c0_2 = arith.constant 0 : index
    %c0_3 = arith.constant 0 : index
    %c0_4 = arith.constant 0 : index
    %1 = vector.load %arg2[%c0_2, %c0_3, %c0_4] : memref<7x4x128xf32, #tpu.memory_space<vmem>>, vector<7x4x128xf32>
    %c0_5 = arith.constant 0 : index
    %c0_6 = arith.constant 0 : index
    %c0_7 = arith.constant 0 : index
    %2 = vector.load %arg3[%c0_5, %c0_6, %c0_7] : memref<7x1x128xf32, #tpu.memory_space<vmem>>, vector<7x1x128xf32>
    "tpu.trace_start"() <{level = 10 : i32, message = "ebf,efo->ebo"}> : () -> ()
    %cst = arith.constant dense<0.000000e+00> : vector<7x8x128xf32>
    %3 = tpu.matmul %0, %1, %cst {dimension_numbers = #tpu.dot_dimension_numbers<[2], [1], [1], [2], [0, 0, 0, 1, 1, 2], [0], [0]>} : vector<7x8x4xf32>, vector<7x4x128xf32>, vector<7x8x128xf32> -> vector<7x8x128xf32>
    "tpu.trace_stop"() : () -> ()
    %4 = vector.broadcast %2 : vector<7x1x128xf32> to vector<7x8x128xf32>
    %5 = arith.addf %3, %4 : vector<7x8x128xf32>
    %6 = math.tanh %5 : vector<7x8x128xf32>
    %c0_8 = arith.constant 0 : index
    %c0_9 = arith.constant 0 : index
    %c0_10 = arith.constant 0 : index
    %7 = vector.load %arg4[%c0_8, %c0_9, %c0_10] : memref<7x128x128xf32, #tpu.memory_space<vmem>>, vector<7x128x128xf32>
    %c0_11 = arith.constant 0 : index
    %c0_12 = arith.constant 0 : index
    %c0_13 = arith.constant 0 : index
    %8 = vector.load %arg5[%c0_11, %c0_12, %c0_13] : memref<7x1x128xf32, #tpu.memory_space<vmem>>, vector<7x1x128xf32>
    "tpu.trace_start"() <{level = 10 : i32, message = "ebf,efo->ebo"}> : () -> ()
    %cst_14 = arith.constant dense<0.000000e+00> : vector<7x8x128xf32>
    %9 = tpu.matmul %6, %7, %cst_14 {dimension_numbers = #tpu.dot_dimension_numbers<[2], [1], [1], [2], [0, 0, 0, 1, 1, 2], [0], [0]>} : vector<7x8x128xf32>, vector<7x128x128xf32>, vector<7x8x128xf32> -> vector<7x8x128xf32>
    "tpu.trace_stop"() : () -> ()
    %10 = vector.broadcast %8 : vector<7x1x128xf32> to vector<7x8x128xf32>
    %11 = arith.addf %9, %10 : vector<7x8x128xf32>
    %12 = math.tanh %11 : vector<7x8x128xf32>
    %c0_15 = arith.constant 0 : index
    %c0_16 = arith.constant 0 : index
    %c0_17 = arith.constant 0 : index
    %13 = vector.load %arg6[%c0_15, %c0_16, %c0_17] : memref<7x128x128xf32, #tpu.memory_space<vmem>>, vector<7x128x128xf32>
    %c0_18 = arith.constant 0 : index
    %c0_19 = arith.constant 0 : index
    %c0_20 = arith.constant 0 : index
    %14 = vector.load %arg7[%c0_18, %c0_19, %c0_20] : memref<7x1x128xf32, #tpu.memory_space<vmem>>, vector<7x1x128xf32>
    "tpu.trace_start"() <{level = 10 : i32, message = "ebf,efo->ebo"}> : () -> ()
    %cst_21 = arith.constant dense<0.000000e+00> : vector<7x8x128xf32>
    %15 = tpu.matmul %12, %13, %cst_21 {dimension_numbers = #tpu.dot_dimension_numbers<[2], [1], [1], [2], [0, 0, 0, 1, 1, 2], [0], [0]>} : vector<7x8x128xf32>, vector<7x128x128xf32>, vector<7x8x128xf32> -> vector<7x8x128xf32>
    "tpu.trace_stop"() : () -> ()
    %16 = vector.broadcast %14 : vector<7x1x128xf32> to vector<7x8x128xf32>
    %17 = arith.addf %15, %16 : vector<7x8x128xf32>
    %c0_22 = arith.constant 0 : index
    %c0_23 = arith.constant 0 : index
    %c0_24 = arith.constant 0 : index
    %18 = vector.load %arg8[%c0_22, %c0_23, %c0_24] : memref<7x8x128xf32, #tpu.memory_space<vmem>>, vector<7x8x128xf32>
    tpu.vector_store %arg8[%c0_22, %c0_23, %c0_24], %17 {strides = array<i32>} : memref<7x8x128xf32, #tpu.memory_space<vmem>>, vector<7x8x128xf32>,
    return
  }
  func.func @transform_0(%arg0: i32) -> (i32, i32, i32) {
    %c0_i32 = arith.constant 0 : i32
    %c0_i32_0 = arith.constant 0 : i32
    %c0_i32_1 = arith.constant 0 : i32
    return %c0_i32, %arg0, %c0_i32_0 : i32, i32, i32
  }
  func.func @transform_1(%arg0: i32) -> (i32, i32, i32) {
    %c0_i32 = arith.constant 0 : i32
    %c0_i32_0 = arith.constant 0 : i32
    %c0_i32_1 = arith.constant 0 : i32
    %c0_i32_2 = arith.constant 0 : i32
    return %c0_i32, %c0_i32_0, %c0_i32_1 : i32, i32, i32
  }
  func.func @transform_2(%arg0: i32) -> (i32, i32, i32) {
    %c0_i32 = arith.constant 0 : i32
    %c0_i32_0 = arith.constant 0 : i32
    %c0_i32_1 = arith.constant 0 : i32
    %c0_i32_2 = arith.constant 0 : i32
    return %c0_i32, %c0_i32_0, %c0_i32_1 : i32, i32, i32
  }
  func.func @transform_3(%arg0: i32) -> (i32, i32, i32) {
    %c0_i32 = arith.constant 0 : i32
    %c0_i32_0 = arith.constant 0 : i32
    %c0_i32_1 = arith.constant 0 : i32
    %c0_i32_2 = arith.constant 0 : i32
    return %c0_i32, %c0_i32_0, %c0_i32_1 : i32, i32, i32
  }
  func.func @transform_4(%arg0: i32) -> (i32, i32, i32) {
    %c0_i32 = arith.constant 0 : i32
    %c0_i32_0 = arith.constant 0 : i32
    %c0_i32_1 = arith.constant 0 : i32
    %c0_i32_2 = arith.constant 0 : i32
    return %c0_i32, %c0_i32_0, %c0_i32_1 : i32, i32, i32
  }
  func.func @transform_5(%arg0: i32) -> (i32, i32, i32) {
    %c0_i32 = arith.constant 0 : i32
    %c0_i32_0 = arith.constant 0 : i32
    %c0_i32_1 = arith.constant 0 : i32
    %c0_i32_2 = arith.constant 0 : i32
    return %c0_i32, %c0_i32_0, %c0_i32_1 : i32, i32, i32
  }
  func.func @transform_6(%arg0: i32) -> (i32, i32, i32) {
    %c0_i32 = arith.constant 0 : i32
    %c0_i32_0 = arith.constant 0 : i32
    %c0_i32_1 = arith.constant 0 : i32
    %c0_i32_2 = arith.constant 0 : i32
    return %c0_i32, %c0_i32_0, %c0_i32_1 : i32, i32, i32
  }
  func.func @transform_7(%arg0: i32) -> (i32, i32, i32) {
    %c0_i32 = arith.constant 0 : i32
    %c0_i32_0 = arith.constant 0 : i32
    %c0_i32_1 = arith.constant 0 : i32
    return %c0_i32, %arg0, %c0_i32_0 : i32, i32, i32
  }
}

module attributes {stable_mosaic.version = 11 : i64} {
  func.func @_fused_mlp_kernel(%arg0: i32, %arg1: memref<7x8x4xf32, #tpu.memory_space<vmem>>, %arg2: memref<7x4x128xf32, #tpu.memory_space<vmem>>, %arg3: memref<7x1x128xf32, #tpu.memory_space<vmem>>, %arg4: memref<7x128x128xf32, #tpu.memory_space<vmem>>, %arg5: memref<7x1x128xf32, #tpu.memory_space<vmem>>, %arg6: memref<7x128x128xf32, #tpu.memory_space<vmem>>, %arg7: memref<7x1x128xf32, #tpu.memory_space<vmem>>, %arg8: memref<7x8x128xf32, #tpu.memory_space<vmem>>) attributes {dimension_semantics = [#tpu.dimension_semantics<parallel>], iteration_bounds = array<i64: 1>, scalar_prefetch = 0 : i64, scratch_operands = 0 : i64, tpu.core_type = #tpu.core_type<tc>, window_params = [{transform_indices = @transform_0, window_bounds = array<i64: 7, 8, 4>}, {pipeline_mode = #tpu.pipeline_mode<synchronous>, transform_indices = @transform_1, window_bounds = array<i64: 7, 4, 128>}, {pipeline_mode = #tpu.pipeline_mode<synchronous>, transform_indices = @transform_2, window_bounds = array<i64: 7, 1, 128>}, {pipeline_mode = #tpu.pipeline_mode<synchronous>, transform_indices = @transform_3, window_bounds = array<i64: 7, 128, 128>}, {pipeline_mode = #tpu.pipeline_mode<synchronous>, transform_indices = @transform_4, window_bounds = array<i64: 7, 1, 128>}, {pipeline_mode = #tpu.pipeline_mode<synchronous>, transform_indices = @transform_5, window_bounds = array<i64: 7, 128, 128>}, {pipeline_mode = #tpu.pipeline_mode<synchronous>, transform_indices = @transform_6, window_bounds = array<i64: 7, 1, 128>}, {transform_indices = @transform_7, window_bounds = array<i64: 7, 8, 128>}]} {
    %c0 = arith.constant 0 : index
    %c0_0 = arith.constant 0 : index
    %c0_1 = arith.constant 0 : index
    %0 = vector.load %arg1[%c0, %c0_0, %c0_1] : memref<7x8x4xf32, #tpu.memory_space<vmem>>, vector<7x8x4xf32>
    %c0_2 = arith.constant 0 : index
    %c0_3 = arith.constant 0 : index
    %c0_4 = arith.constant 0 : index
    %1 = vector.load %arg2[%c0_2, %c0_3, %c0_4] : memref<7x4x128xf32, #tpu.memory_space<vmem>>, vector<7x4x128xf32>
    %c0_5 = arith.constant 0 : index
    %c0_6 = arith.constant 0 : index
    %c0_7 = arith.constant 0 : index
    %2 = vector.load %arg3[%c0_5, %c0_6, %c0_7] : memref<7x1x128xf32, #tpu.memory_space<vmem>>, vector<7x1x128xf32>
    "tpu.trace_start"() <{level = 10 : i32, message = "ebf,efo->ebo"}> : () -> ()
    %cst = arith.constant dense<0.000000e+00> : vector<7x8x128xf32>
    %3 = tpu.matmul %0, %1, %cst {dimension_numbers = #tpu.dot_dimension_numbers<[2], [1], [1], [2], [0, 0, 0, 1, 1, 2], [0], [0]>} : vector<7x8x4xf32>, vector<7x4x128xf32>, vector<7x8x128xf32> -> vector<7x8x128xf32>
    "tpu.trace_stop"() : () -> ()
    %4 = vector.broadcast %2 : vector<7x1x128xf32> to vector<7x8x128xf32>
    %5 = arith.addf %3, %4 : vector<7x8x128xf32>
    %6 = math.tanh %5 : vector<7x8x128xf32>
    %c0_8 = arith.constant 0 : index
    %c0_9 = arith.constant 0 : index
    %c0_10 = arith.constant 0 : index
    %7 = vector.load %arg4[%c0_8, %c0_9, %c0_10] : memref<7x128x128xf32, #tpu.memory_space<vmem>>, vector<7x128x128xf32>
    %c0_11 = arith.constant 0 : index
    %c0_12 = arith.constant 0 : index
    %c0_13 = arith.constant 0 : index
    %8 = vector.load %arg5[%c0_11, %c0_12, %c0_13] : memref<7x1x128xf32, #tpu.memory_space<vmem>>, vector<7x1x128xf32>
    "tpu.trace_start"() <{level = 10 : i32, message = "ebf,efo->ebo"}> : () -> ()
    %cst_14 = arith.constant dense<0.000000e+00> : vector<7x8x128xf32>
    %9 = tpu.matmul %6, %7, %cst_14 {dimension_numbers = #tpu.dot_dimension_numbers<[2], [1], [1], [2], [0, 0, 0, 1, 1, 2], [0], [0]>} : vector<7x8x128xf32>, vector<7x128x128xf32>, vector<7x8x128xf32> -> vector<7x8x128xf32>
    "tpu.trace_stop"() : () -> ()
    %10 = vector.broadcast %8 : vector<7x1x128xf32> to vector<7x8x128xf32>
    %11 = arith.addf %9, %10 : vector<7x8x128xf32>
    %12 = math.tanh %11 : vector<7x8x128xf32>
    %c0_15 = arith.constant 0 : index
    %c0_16 = arith.constant 0 : index
    %c0_17 = arith.constant 0 : index
    %13 = vector.load %arg6[%c0_15, %c0_16, %c0_17] : memref<7x128x128xf32, #tpu.memory_space<vmem>>, vector<7x128x128xf32>
    %c0_18 = arith.constant 0 : index
    %c0_19 = arith.constant 0 : index
    %c0_20 = arith.constant 0 : index
    %14 = vector.load %arg7[%c0_18, %c0_19, %c0_20] : memref<7x1x128xf32, #tpu.memory_space<vmem>>, vector<7x1x128xf32>
    "tpu.trace_start"() <{level = 10 : i32, message = "ebf,efo->ebo"}> : () -> ()
    %cst_21 = arith.constant dense<0.000000e+00> : vector<7x8x128xf32>
    %15 = tpu.matmul %12, %13, %cst_21 {dimension_numbers = #tpu.dot_dimension_numbers<[2], [1], [1], [2], [0, 0, 0, 1, 1, 2], [0], [0]>} : vector<7x8x128xf32>, vector<7x128x128xf32>, vector<7x8x128xf32> -> vector<7x8x128xf32>
    "tpu.trace_stop"() : () -> ()
    %16 = vector.broadcast %14 : vector<7x1x128xf32> to vector<7x8x128xf32>
    %17 = arith.addf %15, %16 : vector<7x8x128xf32>
    %c0_22 = arith.constant 0 : index
    %c0_23 = arith.constant 0 : index
    %c0_24 = arith.constant 0 : index
    %18 = vector.load %arg8[%c0_22, %c0_23, %c0_24] : memref<7x8x128xf32, #tpu.memory_space<vmem>>, vector<7x8x128xf32>
    tpu.vector_store %arg8[%c0_22, %c0_23, %c0_24], %17 {strides = array<i32>} : memref<7x8x128xf32, #tpu.memory_space<vmem>>, vector<7x8x128xf32>,
    return
  }
  func.func @transform_0(%arg0: i32) -> (i32, i32, i32) {
    %c0_i32 = arith.constant 0 : i32
    %c0_i32_0 = arith.constant 0 : i32
    %c0_i32_1 = arith.constant 0 : i32
    return %c0_i32, %arg0, %c0_i32_0 : i32, i32, i32
  }
  func.func @transform_1(%arg0: i32) -> (i32, i32, i32) {
    %c0_i32 = arith.constant 0 : i32
    %c0_i32_0 = arith.constant 0 : i32
    %c0_i32_1 = arith.constant 0 : i32
    %c0_i32_2 = arith.constant 0 : i32
    return %c0_i32, %c0_i32_0, %c0_i32_1 : i32, i32, i32
  }
  func.func @transform_2(%arg0: i32) -> (i32, i32, i32) {
    %c0_i32 = arith.constant 0 : i32
    %c0_i32_0 = arith.constant 0 : i32
    %c0_i32_1 = arith.constant 0 : i32
    %c0_i32_2 = arith.constant 0 : i32
    return %c0_i32, %c0_i32_0, %c0_i32_1 : i32, i32, i32
  }
  func.func @transform_3(%arg0: i32) -> (i32, i32, i32) {
    %c0_i32 = arith.constant 0 : i32
    %c0_i32_0 = arith.constant 0 : i32
    %c0_i32_1 = arith.constant 0 : i32
    %c0_i32_2 = arith.constant 0 : i32
    return %c0_i32, %c0_i32_0, %c0_i32_1 : i32, i32, i32
  }
  func.func @transform_4(%arg0: i32) -> (i32, i32, i32) {
    %c0_i32 = arith.constant 0 : i32
    %c0_i32_0 = arith.constant 0 : i32
    %c0_i32_1 = arith.constant 0 : i32
    %c0_i32_2 = arith.constant 0 : i32
    return %c0_i32, %c0_i32_0, %c0_i32_1 : i32, i32, i32
  }
  func.func @transform_5(%arg0: i32) -> (i32, i32, i32) {
    %c0_i32 = arith.constant 0 : i32
    %c0_i32_0 = arith.constant 0 : i32
    %c0_i32_1 = arith.constant 0 : i32
    %c0_i32_2 = arith.constant 0 : i32
    return %c0_i32, %c0_i32_0, %c0_i32_1 : i32, i32, i32
  }
  func.func @transform_6(%arg0: i32) -> (i32, i32, i32) {
    %c0_i32 = arith.constant 0 : i32
    %c0_i32_0 = arith.constant 0 : i32
    %c0_i32_1 = arith.constant 0 : i32
    %c0_i32_2 = arith.constant 0 : i32
    return %c0_i32, %c0_i32_0, %c0_i32_1 : i32, i32, i32
  }
  func.func @transform_7(%arg0: i32) -> (i32, i32, i32) {
    %c0_i32 = arith.constant 0 : i32
    %c0_i32_0 = arith.constant 0 : i32
    %c0_i32_1 = arith.constant 0 : i32
    return %c0_i32, %arg0, %c0_i32_0 : i32, i32, i32
  }
}

</mosaic_0001>

<bundles_post_ra>
// kernel: tpu_custom_call.1
= control target key start
LH: loop header
LB: loop body
LE: loop exit
PB: predicated region body
PF: predicated region fallthrough
CT: control target
= control target key end

     0   :  { %12 = vsyncpa [#allocation3], 0  ;;  %s3637_s0 = inlined_call_operand.vmem [shape: f32[7,8,4], index: 0, kind: input, shape index: {}]   ;;  %s3638_s1 = inlined_call_operand.vmem [shape: f32[7,4,128], index: 1, kind: input, shape index: {}]   ;;  %s3639_s2 = inlined_call_operand.vmem [shape: f32[7,1,128], index: 2, kind: input, shape index: {}]   ;;  %s3640_s3 = inlined_call_operand.hbm [shape: f32[7,128,128], index: 3, kind: input, shape index: {}]   ;;  %s3641_s4 = inlined_call_operand.vmem [shape: f32[7,1,128], index: 4, kind: input, shape index: {}]   ;;  %s3642_s5 = inlined_call_operand.hbm [shape: f32[7,128,128], index: 5, kind: input, shape index: {}]   ;;  %s3643_s6 = inlined_call_operand.vmem [shape: f32[7,1,128], index: 6, kind: input, shape index: {}]   ;;  %s3644_s7 = inlined_call_operand.hbm [shape: f32[7,8,128], index: 7, kind: output, shape index: {}]  }
   0x1   :  { %13 = vsyncpa [#allocation6], 0 }
   0x2   :  { %14 = vsyncpa [#allocation4], 0  ;;  %s3249_s24 = smov [#allocation2]   ;;  %s3177_s28 = scalar_lea.hbm %s3640_s3, 14336 }
   0x3   :  { %s26_s25 = sshll.u32 %s3249_s24, 4  ;;  %p3178_p0 = scmp.ne.s32.totalorder %s3640_s3, %s3177_s28  ;;  %s27_s25 = int_to_ptr.vmem [resolvable:$true] %s26_s25 }
   0x4   :  { %p3181_p1 = scmp.lt.u32.totalorder %s3177_s28, %s3640_s3 }
   0x6   :  { %p3183_p2 = pnand %p3181_p1, %p3178_p0 }
   0x8   :  { %3186 = shalt.err (!%p3183_p2)
}
   0x9   :  { %s3187_s10 = scalar_lea.vmem %s27_s25, 14336  ;;  %p3192_p4 = scmp.lt.s32.totalorder %s27_s25, %s27_s25 }
   0xa   :  { %p3188_p3 = scmp.ne.s32.totalorder %s27_s25, %s3187_s10  ;;  %p3193_p5 = scmp.lt.s32.totalorder %s3187_s10, %s3187_s10 }
   0xc   :  { %p3194_p6 = por %p3193_p5, %p3192_p4 }
   0xe   :  { %p3195_p7 = pnand %p3194_p6, %p3188_p3 }
  0x10   :  { %3198 = shalt.err (!%p3195_p7)
}
  0x11   :  { %s3250_s11 = smov 128   ;;  %s3251_s12 = smov 8  }
  0x12   :  { %32 = dma.hbm_to_vmem [thread:$0]  %s3640_s3, 14336, %s27_s25, [#allocation3], %s3250_s11, %s3250_s11, %s3251_s12  }
  0x13   :  { %s3252_s15 = smov [#allocation5]   ;;  %s3199_s19 = scalar_lea.hbm %s3642_s5, 14336 }
  0x14   :  { %s40_s16 = sshll.u32 %s3252_s15, 4  ;;  %p3200_p8 = scmp.ne.s32.totalorder %s3642_s5, %s3199_s19  ;;  %s41_s16 = int_to_ptr.vmem [resolvable:$true] %s40_s16 }
  0x15   :  { %p3203_p9 = scmp.lt.u32.totalorder %s3199_s19, %s3642_s5 }
  0x17   :  { %p3205_p10 = pnand %p3203_p9, %p3200_p8 }
  0x19   :  { %3208 = shalt.err (!%p3205_p10)
}
  0x1a   :  { %s3209_s24 = scalar_lea.vmem %s41_s16, 14336  ;;  %p3214_p12 = scmp.lt.s32.totalorder %s41_s16, %s41_s16 }
  0x1b   :  { %p3210_p11 = scmp.ne.s32.totalorder %s41_s16, %s3209_s24  ;;  %p3215_p13 = scmp.lt.s32.totalorder %s3209_s24, %s3209_s24 }
  0x1d   :  { %p3216_p0 = por %p3215_p13, %p3214_p12 }
  0x1f   :  { %p3217_p1 = pnand %p3216_p0, %p3210_p11 }
  0x21   :  { %3220 = shalt.err (!%p3217_p1)
}
  0x22   :  { %46 = dma.hbm_to_vmem [thread:$0]  %s3642_s5, 14336, %s41_s16, [#allocation6], %s3250_s11, %s3250_s11, %s3251_s12  }
  0x23   :  { %3243 = dma.done.wait [#allocation3], 14336  }
  0x24   :  { %3244 = vsyncadd [#allocation3], 4294952960 }
  0x25   :  { %3245 = dma.done.wait [#allocation6], 14336  }
  0x26   :  { %3246 = vsyncadd [#allocation6], 4294952960  ;;  %v3253_v0 = vmov 0.0   ;;  %vm3254_vm0 = vmmov 0   ;;  %vm122_vm1 = vcmask 1043456   ;;  %vm118_vm2 = vcmask 31744  }
  0x27   :  { %2280 = vmatprep.subr.mxu0 %v3253_v0  ;;  %2282 = vmatprep.mubr.msk.f32.mxu0 %vm3254_vm0, %v3253_v0  ;;  %v62_v1 = vld [vmem:[%s3638_s1] sm:$0xf]  ;;  %v64_v3 = vld [vmem:[%s3638_s1 + $0x8] sm:$0xf]  ;;  %v63_v4 = vld [vmem:[%s3638_s1 + $0x4] sm:$0xf] }
  0x28   :  { %2285 = vmatprep.subr.mxu1 %v3253_v0  ;;  %2287 = vmatprep.mubr.msk.f32.mxu1 %vm3254_vm0, %v3253_v0  ;;  %v55_v2 = vld [vmem:[%s3637_s0] sm:$0xff]  ;;  %v56_v5 = vld [vmem:[%s3637_s0 + $0x8] sm:$0xff]  ;;  %v57_v6 = vld [vmem:[%s3637_s0 + $0x10] sm:$0xff]  ;;  %v3255_v20 = vmov 0.0|0.0   ;;  %s3256_s21 = smov [#allocation7]  }
  0x29   :  { %2281 = vmatpush3.msk.msra.mxu0 %vm122_vm1, %v62_v1  ;;  %2286 = vmatpush3.msk.msra.mxu1 %vm122_vm1, %v63_v4  ;;  %v65_v7 = vld [vmem:[%s3638_s1 + $0xc] sm:$0xf]  ;;  %v66_v8 = vld [vmem:[%s3638_s1 + $0x10] sm:$0xf]  ;;  %v58_v9 = vld [vmem:[%s3637_s0 + $0x18] sm:$0xff]  ;;  %s1980_s22 = sshll.u32 %s3256_s21, 4  ;;  %s1981_s22 = int_to_ptr.vmem [resolvable:$true] %s1980_s22 }
  0x2a   :  { %2283 = vmatmul.mubr.msk.f32.vlgmr.msra.gmra.mrb[0].mxu0 %vm118_vm2, %v55_v2  ;;  %2290 = vmatprep.subr.mxu0 %v3253_v0  ;;  %v59_v10 = vld [vmem:[%s3637_s0 + $0x20] sm:$0xff]  ;;  %v67_v11 = vld [vmem:[%s3638_s1 + $0x14] sm:$0xf]  ;;  %v660_v13 = vld [vmem:[#allocation2 + $0x8] sm:$0xff]  ;;  %s3221_s23 = scalar_lea.vmem %s1981_s22, 896  ;;  %p3226_p3 = scmp.lt.s32.totalorder %s1981_s22, %s1981_s22 }
  0x2b   :  { %2291 = vmatpush3.msk.msra.mxu0 %vm122_vm1, %v64_v3  ;;  %2292 = vmatprep.mubr.msk.f32.mxu0 %vm3254_vm0, %v3253_v0  ;;  %v659_v12 = vld [vmem:[#allocation2] sm:$0xff]  ;;  %v68_v14 = vld [vmem:[%s3638_s1 + $0x18] sm:$0xf]  ;;  %v60_v15 = vld [vmem:[%s3637_s0 + $0x28] sm:$0xff]  ;;  %p3222_p2 = scmp.ne.s32.totalorder %s1981_s22, %s3221_s23  ;;  %p3227_p4 = scmp.lt.s32.totalorder %s3221_s23, %s3221_s23 }
  0x2c   :  { %2288 = vmatmul.mubr.msk.f32.vlgmr.msra.gmra.mrb[0].mxu1 %vm118_vm2, %v56_v5  ;;  %2295 = vmatprep.subr.mxu1 %v3253_v0  ;;  %v2806_v16 = vpack.c.bf16 %v660_v13, %v659_v12  ;;  %v61_v17 = vld [vmem:[%s3637_s0 + $0x30] sm:$0xff]  ;;  %v662_v19 = vld [vmem:[#allocation2 + $0x18] sm:$0xff]  ;;  %v663_v22 = vld [vmem:[#allocation2 + $0x20] sm:$0xff] }
  0x2d   :  { %2300 = vmatprep.subr.mxu0 %v3253_v0  ;;  %2296 = vmatpush3.msk.msra.mxu1 %vm122_vm1, %v65_v7  ;;  %v661_v18 = vld [vmem:[#allocation2 + $0x10] sm:$0xff]  ;;  %v664_v23 = vld [vmem:[#allocation2 + $0x28] sm:$0xff]  ;;  %v666_v26 = vld [vmem:[#allocation2 + $0x38] sm:$0xff]  ;;  %p3228_p5 = por %p3227_p4, %p3226_p3 }
  0x2e   :  { %2293 = vmatmul.mubr.msk.f32.vlgmr.msra.gmra.mrb[2].mxu0 %vm118_vm2, %v57_v6  ;;  %2297 = vmatprep.mubr.msk.f32.mxu1 %vm3254_vm0, %v3253_v0  ;;  %v2809_v21 = vpack.c.bf16 %v662_v19, %v661_v18  ;;  %v2812_v24 = vpack.c.bf16 %v664_v23, %v663_v22  ;;  %v665_v25 = vld [vmem:[#allocation2 + $0x30] sm:$0xff]  ;;  %v667_v28 = vld [vmem:[#allocation2 + $0x40] sm:$0xff]  ;;  %v668_v29 = vld [vmem:[#allocation2 + $0x48] sm:$0xff] }
  0x2f   :  { %2301 = vmatpush3.msk.msra.mxu0 %vm122_vm1, %v66_v8  ;;  %2302 = vmatprep.mubr.msk.f32.mxu0 %vm3254_vm0, %v3253_v0  ;;  %v2815_v27 = vpack.c.bf16 %v666_v26, %v665_v25  ;;  %v2818_v30 = vpack.c.bf16 %v668_v29, %v667_v28  ;;  %v669_v31 = vld [vmem:[#allocation2 + $0x50] sm:$0xff]  ;;  %v670_v32 = vld [vmem:[#allocation2 + $0x58] sm:$0xff]  ;;  %v671_v34 = vld [vmem:[#allocation2 + $0x60] sm:$0xff]  ;;  %p3229_p6 = pnand %p3228_p5, %p3222_p2 }
  0x30   :  { %2298 = vmatmul.mubr.msk.f32.vlgmr.msra.gmra.mrb[2].mxu1 %vm118_vm2, %v58_v9  ;;  %2305 = vmatprep.subr.mxu1 %v3253_v0  ;;  %v2821_v33 = vpack.c.bf16 %v670_v32, %v669_v31  ;;  %v672_v35 = vld [vmem:[#allocation2 + $0x68] sm:$0xff]  ;;  %v673_v36 = vld [vmem:[#allocation2 + $0x70] sm:$0xff]  ;;  %v674_v38 = vld [vmem:[#allocation2 + $0x78] sm:$0xff] }
  0x31   :  { %2310 = vmatprep.subr.mxu0 %v3253_v0  ;;  %2306 = vmatpush3.msk.msra.mxu1 %vm122_vm1, %v67_v11  ;;  %v2824_v37 = vpack.c.bf16 %v672_v35, %v671_v34  ;;  %v675_v39 = vld [vmem:[#allocation2 + $0x80] sm:$0xff]  ;;  %v676_v40 = vld [vmem:[#allocation2 + $0x88] sm:$0xff]  ;;  %v2827_v42 = vpack.c.bf16 %v674_v38, %v673_v36  ;;  %v677_v43 = vld [vmem:[#allocation2 + $0x90] sm:$0xff] }
  0x32   :  { %2303 = vmatmul.mubr.msk.f32.vlgmr.msra.gmra.mrb[4].mxu0 %vm118_vm2, %v59_v10  ;;  %2307 = vmatprep.mubr.msk.f32.mxu1 %vm3254_vm0, %v3253_v0  ;;  %v2830_v41 = vpack.c.bf16 %v676_v40, %v675_v39  ;;  %v678_v44 = vld [vmem:[#allocation2 + $0x98] sm:$0xff]  ;;  %v679_v46 = vld [vmem:[#allocation2 + $0xa0] sm:$0xff]  ;;  %v680_v47 = vld [vmem:[#allocation2 + $0xa8] sm:$0xff] }
  0x33   :  { %2311 = vmatpush3.msk.msra.mxu0 %vm122_vm1, %v68_v14  ;;  %2312 = vmatprep.mubr.msk.f32.mxu0 %vm3254_vm0, %v3253_v0  ;;  %v2833_v45 = vpack.c.bf16 %v678_v44, %v677_v43  ;;  %v2836_v48 = vpack.c.bf16 %v680_v47, %v679_v46  ;;  %v681_v49 = vld [vmem:[#allocation2 + $0xb0] sm:$0xff]  ;;  %v682_v50 = vld [vmem:[#allocation2 + $0xb8] sm:$0xff]  ;;  %v683_v52 = vld [vmem:[#allocation2 + $0xc0] sm:$0xff] }
  0x34   :  { %2308 = vmatmul.mubr.msk.f32.vlgmr.msra.gmra.mrb[4].mxu1 %vm118_vm2, %v60_v15  ;;  %2805 = vmatprep.subr.bf16.mxu1 %v3255_v20  ;;  %v2839_v51 = vpack.c.bf16 %v682_v50, %v681_v49  ;;  %v684_v53 = vld [vmem:[#allocation2 + $0xc8] sm:$0xff]  ;;  %v685_v55 = vld [vmem:[#allocation2 + $0xd0] sm:$0xff]  ;;  %v686_v56 = vld [vmem:[#allocation2 + $0xd8] sm:$0xff] }
  0x35   :  { %2829 = vmatprep.subr.bf16.mxu0 %v3255_v20  ;;  %2807 = vmatpush3.bf16.msra.mxu1 %v2806_v16  ;;  %v2842_v54 = vpack.c.bf16 %v684_v53, %v683_v52  ;;  %v2845_v57 = vpack.c.bf16 %v686_v56, %v685_v55  ;;  %v687_v58 = vld [vmem:[#allocation2 + $0xe0] sm:$0xff]  ;;  %v688_v59 = vld [vmem:[#allocation2 + $0xe8] sm:$0xff]  ;;  %v689_v61 = vld [vmem:[#allocation2 + $0xf0] sm:$0xff] }
  0x36   :  { %2313 = vmatmul.mubr.msk.f32.vlgmr.msra.gmra.mrb[6].mxu0 %vm118_vm2, %v61_v17  ;;  %2808 = vmatprep.subr.bf16.mxu1 %v3255_v20  ;;  %v2848_v60 = vpack.c.bf16 %v688_v59, %v687_v58  ;;  %v690_v62 = vld [vmem:[#allocation2 + $0xf8] sm:$0xff]  ;;  %v1993_v1 = vld [vmem:[%s3639_s2] ss:$0 sm:$0xff]  ;;  %v1994_v3 = vld [vmem:[%s3639_s2 + $0x1] ss:$0 sm:$0xff] }
  0x37   :  { %2347 = vmatprep.mubr.msk.f32.mxu1 %vm3254_vm0, %v3253_v0  ;;  %2382 = vmatprep.mubr.msk.f32.mxu0 %vm3254_vm0, %v3253_v0  ;;  %v2851_v63 = vpack.c.bf16 %v690_v62, %v689_v61  ;;  %v691_v13 = vld [vmem:[#allocation2 + $0x100] sm:$0xff]  ;;  %v692_v14 = vld [vmem:[#allocation2 + $0x108] sm:$0xff]  ;;  %v693_v23 = vld [vmem:[#allocation2 + $0x110] sm:$0xff] }
  0x38   :  { %2831 = vmatpush3.bf16.msra.mxu0 %v2830_v41  ;;  %v707_v17 = vld [vmem:[#allocation2 + $0x180] sm:$0xff]  ;;  %v708_v18 = vld [vmem:[#allocation2 + $0x188] sm:$0xff]  ;;  %v709_v29 = vld [vmem:[#allocation2 + $0x190] sm:$0xff] }
  0x39   :  { %2810 = vmatpush3.bf16.msra.mxu1 %v2809_v21  ;;  %2832 = vmatprep.subr.bf16.mxu0 %v3255_v20  ;;  %v2854_v21 = vpack.c.bf16 %v692_v14, %v691_v13  ;;  %v696_v34 = vld [vmem:[#allocation2 + $0x128] sm:$0xff]  ;;  %v711_v36 = vld [vmem:[#allocation2 + $0x1a0] sm:$0xff]  ;;  %v697_v39 = vld [vmem:[#allocation2 + $0x130] sm:$0xff] }
  0x3a   :  { %2811 = vmatprep.subr.bf16.mxu1 %v3255_v20  ;;  %v698_v40 = vld [vmem:[#allocation2 + $0x138] sm:$0xff]  ;;  %v700_v46 = vld [vmem:[#allocation2 + $0x148] sm:$0xff]  ;;  %v715_v49 = vld [vmem:[#allocation2 + $0x1c0] sm:$0xff] }
  0x3b   :  { %v714_v43 = vld [vmem:[#allocation2 + $0x1b8] sm:$0xff]  ;;  %v2863_v44 = vpack.c.bf16 %v698_v40, %v697_v39  ;;  %v716_v50 = vld [vmem:[#allocation2 + $0x1c8] sm:$0xff]  ;;  %v701_v52 = vld [vmem:[#allocation2 + $0x150] sm:$0xff] }
  0x3c   :  { %2834 = vmatpush3.bf16.msra.mxu0 %v2833_v45  ;;  %v699_v45 = vld [vmem:[#allocation2 + $0x140] sm:$0xff]  ;;  %v702_v53 = vld [vmem:[#allocation2 + $0x158] sm:$0xff]  ;;  %v2890_v56 = vpack.c.bf16 %v716_v50, %v715_v49  ;;  %v704_v62 = vld [vmem:[#allocation2 + $0x168] sm:$0xff] }
  0x3d   :  { %2813 = vmatpush3.bf16.msra.mxu1 %v2812_v24  ;;  %2835 = vmatprep.subr.bf16.mxu0 %v3255_v20  ;;  %v694_v24 = vld [vmem:[#allocation2 + $0x118] sm:$0xff]  ;;  %v2869_v59 = vpack.c.bf16 %v702_v53, %v701_v52  ;;  %v703_v61 = vld [vmem:[#allocation2 + $0x160] sm:$0xff]  ;;  %v740_v14 = vld [vmem:[#allocation2 + $0x288] sm:$0xff] }
  0x3e   :  { %2814 = vmatprep.subr.bf16.mxu1 %v3255_v20  ;;  %v2857_v32 = vpack.c.bf16 %v694_v24, %v693_v23  ;;  %v718_v58 = vld [vmem:[#allocation2 + $0x1d8] sm:$0xff]  ;;  %v739_v13 = vld [vmem:[#allocation2 + $0x280] sm:$0xff]  ;;  %v741_v24 = vld [vmem:[#allocation2 + $0x290] sm:$0xff] }
  0x3f   :  { %v2926_v23 = vpack.c.bf16 %v740_v14, %v739_v13  ;;  %v731_v40 = vld [vmem:[#allocation2 + $0x240] sm:$0xff]  ;;  %v749_v52 = vld [vmem:[#allocation2 + $0x2d0] sm:$0xff]  ;;  %v750_v53 = vld [vmem:[#allocation2 + $0x2d8] sm:$0xff] }
  0x40   :  { %2837 = vmatpush3.bf16.msra.mxu0 %v2836_v48  ;;  %v1995_v48 = vld [vmem:[%s3639_s2 + $0x2] ss:$0 sm:$0xff]  ;;  %v1998_v49 = vld [vmem:[%s3639_s2 + $0x5] ss:$0 sm:$0xff]  ;;  %v1319_v14 = vld [vmem:[#allocation5 + $0x10] sm:$0xff] }
  0x41   :  { %2816 = vmatpush3.bf16.msra.mxu1 %v2815_v27  ;;  %2838 = vmatprep.subr.bf16.mxu0 %v3255_v20  ;;  %v2878_v27 = vpack.c.bf16 %v708_v18, %v707_v17  ;;  %v725_v18 = vld [vmem:[#allocation2 + $0x210] sm:$0xff] }
  0x42   :  { %2817 = vmatprep.subr.bf16.mxu1 %v3255_v20 }
  0x44   :  { %2840 = vmatpush3.bf16.msra.mxu0 %v2839_v51  ;;  %v2866_v51 = vpack.c.bf16 %v700_v46, %v699_v45  ;;  %v748_v45 = vld [vmem:[#allocation2 + $0x2c8] sm:$0xff] }
  0x45   :  { %2819 = vmatpush3.bf16.msra.mxu1 %v2818_v30  ;;  %2841 = vmatprep.subr.bf16.mxu0 %v3255_v20  ;;  %v710_v30 = vld [vmem:[#allocation2 + $0x198] sm:$0xff] }
  0x46   :  { %2820 = vmatprep.subr.bf16.mxu1 %v3255_v20  ;;  %v2881_v35 = vpack.c.bf16 %v710_v30, %v709_v29  ;;  %v728_v29 = vld [vmem:[#allocation2 + $0x228] sm:$0xff] }
  0x48   :  { %2843 = vmatpush3.bf16.msra.mxu0 %v2842_v54  ;;  %v1996_v54 = vld [vmem:[%s3639_s2 + $0x3] ss:$0 sm:$0xff] }
  0x49   :  { %2822 = vmatpush3.bf16.msra.mxu1 %v2821_v33  ;;  %2844 = vmatprep.subr.bf16.mxu0 %v3255_v20  ;;  %v695_v33 = vld [vmem:[#allocation2 + $0x120] sm:$0xff] }
  0x4a   :  { %2823 = vmatprep.subr.bf16.mxu1 %v3255_v20  ;;  %v2860_v38 = vpack.c.bf16 %v696_v34, %v695_v33  ;;  %v729_v34 = vld [vmem:[#allocation2 + $0x230] sm:$0xff] }
  0x4c   :  { %2846 = vmatpush3.bf16.msra.mxu0 %v2845_v57  ;;  %v717_v57 = vld [vmem:[#allocation2 + $0x1d0] sm:$0xff] }
  0x4d   :  { %2825 = vmatpush3.bf16.msra.mxu1 %v2824_v37  ;;  %2847 = vmatprep.subr.bf16.mxu0 %v3255_v20  ;;  %v712_v37 = vld [vmem:[#allocation2 + $0x1a8] sm:$0xff] }
  0x4e   :  { %2826 = vmatprep.subr.bf16.mxu1 %v3255_v20  ;;  %v2884_v41 = vpack.c.bf16 %v712_v37, %v711_v36  ;;  %v745_v37 = vld [vmem:[#allocation2 + $0x2b0] sm:$0xff] }
  0x50   :  { %2849 = vmatpush3.bf16.msra.mxu0 %v2848_v60 }
  0x51   :  { %2828 = vmatpush3.bf16.msra.mxu1 %v2827_v42  ;;  %2850 = vmatprep.subr.bf16.mxu0 %v3255_v20  ;;  %v713_v42 = vld [vmem:[#allocation2 + $0x1b0] sm:$0xff] }
  0x52   :  { %2853 = vmatprep.subr.bf16.mxu1 %v3255_v20  ;;  %v2887_v47 = vpack.c.bf16 %v714_v43, %v713_v42  ;;  %v1997_v43 = vld [vmem:[%s3639_s2 + $0x4] ss:$0 sm:$0xff] }
  0x54   :  { %2852 = vmatpush3.bf16.msra.mxu0 %v2851_v63  ;;  %v2893_v63 = vpack.c.bf16 %v718_v58, %v717_v57  ;;  %v736_v57 = vld [vmem:[#allocation2 + $0x268] sm:$0xff]  ;;  %v2941_v58 = vpack.c.bf16 %v750_v53, %v749_v52  ;;  %v1329_v52 = vld [vmem:[#allocation5 + $0x60] sm:$0xff] }
  0x55   :  { %2877 = vmatprep.subr.bf16.mxu0 %v3255_v20  ;;  %v1330_v53 = vld [vmem:[#allocation5 + $0x68] sm:$0xff] }
  0xfd   :  { %v192_v2 = vpop.f32.mrb[0].mxu0 }
  0xfe   :  { %v193_v4 = vadd.f32 %v1993_v1, %v192_v2  ;;  %v2284_v5 = vpop.f32.mrb[1].mxu0  ;;  %v719_v1 = vld [vmem:[#allocation2 + $0x1e0] sm:$0xff]  ;;  %v720_v2 = vld [vmem:[#allocation2 + $0x1e8] sm:$0xff] }
  0xff   :  { %v268_v6 = vpop.f32.mrb[0].mxu1  ;;  %v706_v5 = vld [vmem:[#allocation2 + $0x178] sm:$0xff] }
 0x100   :  { %3149 = vtanh.f32 %v193_v4  ;;  %v269_v7 = vadd.f32 %v1994_v3, %v268_v6  ;;  %v2289_v8 = vpop.f32.mrb[1].mxu1  ;;  %v2872_v3 = vpack.c.bf16 %v704_v62, %v703_v61  ;;  %v705_v4 = vld [vmem:[#allocation2 + $0x170] sm:$0xff]  ;;  %v2896_v6 = vpack.c.bf16 %v720_v2, %v719_v1  ;;  %v738_v62 = vld [vmem:[#allocation2 + $0x278] sm:$0xff] }
 0x101   :  { %v3432_v9 = vpop.f32.mrb[2].mxu0  ;;  %v722_v8 = vld [vmem:[#allocation2 + $0x1f8] sm:$0xff]  ;;  %v737_v61 = vld [vmem:[#allocation2 + $0x270] sm:$0xff] }
 0x102   :  { %3151 = vtanh.f32 %v269_v7  ;;  %v2294_v10 = vpop.f32.mrb[3].mxu0  ;;  %v345_v55 = vadd.f32 %v1995_v48, %v3432_v9  ;;  %v721_v7 = vld [vmem:[#allocation2 + $0x1f0] sm:$0xff]  ;;  %v2875_v9 = vpack.c.bf16 %v706_v5, %v705_v4  ;;  %v734_v48 = vld [vmem:[#allocation2 + $0x258] sm:$0xff]  ;;  %v2923_v2 = vpack.c.bf16 %v738_v62, %v737_v61  ;;  %v756_v4 = vld [vmem:[#allocation2 + $0x308] sm:$0xff] }
 0x103   :  { %v3434_v11 = vpop.f32.mrb[2].mxu1  ;;  %v723_v10 = vld [vmem:[#allocation2 + $0x200] sm:$0xff]  ;;  %v754_v1 = vld [vmem:[#allocation2 + $0x2f8] sm:$0xff]  ;;  %v1335_v62 = vld [vmem:[#allocation5 + $0x90] sm:$0xff] }
 0x104   :  { %v2299_v12 = vpop.f32.mrb[3].mxu1  ;;  %v421_v60 = vadd.f32 %v1996_v54, %v3434_v11  ;;  %3153 = vtanh.f32 %v345_v55  ;;  %v724_v11 = vld [vmem:[#allocation2 + $0x208] sm:$0xff] }
 0x105   :  { %v3436_v15 = vpop.f32.mrb[4].mxu0  ;;  %v2899_v12 = vpack.c.bf16 %v722_v8, %v721_v7  ;;  %v2902_v17 = vpack.c.bf16 %v724_v11, %v723_v10  ;;  %v1318_v7 = vld [vmem:[#allocation5 + $0x8] sm:$0xff]  ;;  %v757_v10 = vld [vmem:[#allocation2 + $0x310] sm:$0xff]  ;;  %v758_v11 = vld [vmem:[#allocation2 + $0x318] sm:$0xff] }
 0x106   :  { %v2304_v16 = vpop.f32.mrb[5].mxu0  ;;  %3155 = vtanh.f32 %v421_v60  ;;  %v497_v50 = vadd.f32 %v1997_v43, %v3436_v15  ;;  %v751_v15 = vld [vmem:[#allocation2 + $0x2e0] sm:$0xff] }
 0x107   :  { %v3438_v19 = vpop.f32.mrb[4].mxu1 }
 0x108   :  { %v2309_v22 = vpop.f32.mrb[5].mxu1  ;;  %v573_v55 = vadd.f32 %v1998_v49, %v3438_v19  ;;  %3157 = vtanh.f32 %v497_v50 }
 0x109   :  { %v3440_v25 = vpop.f32.mrb[6].mxu0 }
 0x10a   :  { %v3150_v26 = vpop.eup %3149  ;;  %v2314_v28 = vpop.f32.mrb[7].mxu0  ;;  %3159 = vtanh.f32 %v573_v55  ;;  %v1331_v55 = vld [vmem:[#allocation5 + $0x70] sm:$0xff] }
 0x10b   :  { %2348 = vmatmul.mubr.f32.vlgmr.msra.gmra.mrb[6].mxu1 %v3150_v26  ;;  %v742_v26 = vld [vmem:[#allocation2 + $0x298] sm:$0xff]  ;;  %v727_v28 = vld [vmem:[#allocation2 + $0x220] sm:$0xff] }
 0x10c   :  { %v3152_v31 = vpop.eup %3151  ;;  %2855 = vmatpush3.bf16.msra.mxu1 %v2854_v21  ;;  %2417 = vmatprep.mubr.msk.f32.mxu1 %vm3254_vm0, %v3253_v0  ;;  %v726_v21 = vld [vmem:[#allocation2 + $0x218] sm:$0xff]  ;;  %v2929_v30 = vpack.c.bf16 %v742_v26, %v741_v24  ;;  %v2908_v33 = vpack.c.bf16 %v728_v29, %v727_v28  ;;  %v1322_v24 = vld [vmem:[#allocation5 + $0x28] sm:$0xff] }
 0x10d   :  { %2856 = vmatprep.subr.bf16.mxu1 %v3255_v20  ;;  %2383 = vmatmul.mubr.f32.vlgmr.msra.gmra.mrb[8].mxu0 %v3152_v31  ;;  %v743_v31 = vld [vmem:[#allocation2 + $0x2a0] sm:$0xff]  ;;  %v762_v28 = vld [vmem:[#allocation2 + $0x338] sm:$0xff] }
 0x10e   :  { %2879 = vmatpush3.bf16.msra.mxu0 %v2878_v27  ;;  %2452 = vmatprep.mubr.msk.f32.mxu0 %vm3254_vm0, %v3253_v0  ;;  %v3154_v16 = vpop.eup %3153  ;;  %v2905_v27 = vpack.c.bf16 %v726_v21, %v725_v18  ;;  %v759_v18 = vld [vmem:[#allocation2 + $0x320] sm:$0xff]  ;;  %v760_v21 = vld [vmem:[#allocation2 + $0x328] sm:$0xff] }
 0x10f   :  { %2880 = vmatprep.subr.bf16.mxu0 %v3255_v20  ;;  %v2956_v26 = vpack.c.bf16 %v760_v21, %v759_v18  ;;  %v1348_v18 = vld [vmem:[#allocation5 + $0xf8] sm:$0xff] }
 0x110   :  { %2858 = vmatpush3.bf16.msra.mxu1 %v2857_v32  ;;  %v3156_v22 = vpop.eup %3155  ;;  %v744_v32 = vld [vmem:[#allocation2 + $0x2a8] sm:$0xff] }
 0x111   :  { %2859 = vmatprep.subr.bf16.mxu1 %v3255_v20  ;;  %v2932_v36 = vpack.c.bf16 %v744_v32, %v743_v31  ;;  %v1324_v31 = vld [vmem:[#allocation5 + $0x38] sm:$0xff] }
 0x112   :  { %2882 = vmatpush3.bf16.msra.mxu0 %v2881_v35  ;;  %v730_v35 = vld [vmem:[#allocation2 + $0x238] sm:$0xff]  ;;  %v3158_v8 = vpop.eup %3157 }
 0x113   :  { %2883 = vmatprep.subr.bf16.mxu0 %v3255_v20  ;;  %v2911_v39 = vpack.c.bf16 %v730_v35, %v729_v34  ;;  %v764_v34 = vld [vmem:[#allocation2 + $0x348] sm:$0xff] }
 0x114   :  { %2861 = vmatpush3.bf16.msra.mxu1 %v2860_v38  ;;  %v746_v38 = vld [vmem:[#allocation2 + $0x2b8] sm:$0xff] }
 0x115   :  { %2862 = vmatprep.subr.bf16.mxu1 %v3255_v20  ;;  %v2935_v42 = vpack.c.bf16 %v746_v38, %v745_v37  ;;  %v1325_v37 = vld [vmem:[#allocation5 + $0x40] sm:$0xff]  ;;  %v1326_v38 = vld [vmem:[#allocation5 + $0x48] sm:$0xff] }
 0x116   :  { %2885 = vmatpush3.bf16.msra.mxu0 %v2884_v41  ;;  %v732_v41 = vld [vmem:[#allocation2 + $0x248] sm:$0xff]  ;;  %v2986_v43 = vpack.c.bf16 %v1326_v38, %v1325_v37  ;;  %v1352_v37 = vld [vmem:[#allocation5 + $0x118] sm:$0xff] }
 0x117   :  { %2886 = vmatprep.subr.bf16.mxu0 %v3255_v20  ;;  %v2914_v46 = vpack.c.bf16 %v732_v41, %v731_v40  ;;  %v765_v40 = vld [vmem:[#allocation2 + $0x350] sm:$0xff]  ;;  %v766_v41 = vld [vmem:[#allocation2 + $0x358] sm:$0xff] }
 0x118   :  { %2864 = vmatpush3.bf16.msra.mxu1 %v2863_v44  ;;  %v747_v44 = vld [vmem:[#allocation2 + $0x2c0] sm:$0xff] }
 0x119   :  { %2865 = vmatprep.subr.bf16.mxu1 %v3255_v20 }
 0x11a   :  { %2888 = vmatpush3.bf16.msra.mxu0 %v2887_v47  ;;  %v733_v47 = vld [vmem:[#allocation2 + $0x250] sm:$0xff] }
 0x11b   :  { %2889 = vmatprep.subr.bf16.mxu0 %v3255_v20  ;;  %v2917_v54 = vpack.c.bf16 %v734_v48, %v733_v47  ;;  %v1327_v47 = vld [vmem:[#allocation5 + $0x50] sm:$0xff]  ;;  %v1328_v48 = vld [vmem:[#allocation5 + $0x58] sm:$0xff] }
 0x11c   :  { %2867 = vmatpush3.bf16.msra.mxu1 %v2866_v51  ;;  %v2938_v51 = vpack.c.bf16 %v748_v45, %v747_v44  ;;  %v2965_v44 = vpack.c.bf16 %v766_v41, %v765_v40  ;;  %v767_v45 = vld [vmem:[#allocation2 + $0x360] sm:$0xff]  ;;  %v2989_v49 = vpack.c.bf16 %v1328_v48, %v1327_v47  ;;  %v1367_v40 = vld [vmem:[#allocation5 + $0x190] sm:$0xff]  ;;  %v1368_v41 = vld [vmem:[#allocation5 + $0x198] sm:$0xff] }
 0x11d   :  { %2868 = vmatprep.subr.bf16.mxu1 %v3255_v20  ;;  %v1369_v47 = vld [vmem:[#allocation5 + $0x1a0] sm:$0xff]  ;;  %v1370_v48 = vld [vmem:[#allocation5 + $0x1a8] sm:$0xff] }
 0x11e   :  { %2891 = vmatpush3.bf16.msra.mxu0 %v2890_v56  ;;  %v735_v56 = vld [vmem:[#allocation2 + $0x260] sm:$0xff] }
 0x11f   :  { %2892 = vmatprep.subr.bf16.mxu0 %v3255_v20  ;;  %v2920_v60 = vpack.c.bf16 %v736_v57, %v735_v56  ;;  %v1332_v56 = vld [vmem:[#allocation5 + $0x78] sm:$0xff] }
 0x120   :  { %2870 = vmatpush3.bf16.msra.mxu1 %v2869_v59  ;;  %v752_v59 = vld [vmem:[#allocation2 + $0x2e8] sm:$0xff] }
 0x121   :  { %2871 = vmatprep.subr.bf16.mxu1 %v3255_v20  ;;  %v2944_v19 = vpack.c.bf16 %v752_v59, %v751_v15  ;;  %v1334_v15 = vld [vmem:[#allocation5 + $0x88] sm:$0xff]  ;;  %v2995_v59 = vpack.c.bf16 %v1332_v56, %v1331_v55  ;;  %v1357_v55 = vld [vmem:[#allocation5 + $0x140] sm:$0xff] }
 0x122   :  { %2894 = vmatpush3.bf16.msra.mxu0 %v2893_v63  ;;  %v753_v63 = vld [vmem:[#allocation2 + $0x2f0] sm:$0xff]  ;;  %v1358_v56 = vld [vmem:[#allocation5 + $0x148] sm:$0xff] }
 0x123   :  { %2895 = vmatprep.subr.bf16.mxu0 %v3255_v20  ;;  %v2947_v5 = vpack.c.bf16 %v754_v1, %v753_v63  ;;  %v1337_v1 = vld [vmem:[#allocation5 + $0xa0] sm:$0xff] }
 0x124   :  { %2873 = vmatpush3.bf16.msra.mxu1 %v2872_v3  ;;  %v755_v3 = vld [vmem:[#allocation2 + $0x300] sm:$0xff] }
 0x125   :  { %2874 = vmatprep.subr.bf16.mxu1 %v3255_v20 }
 0x126   :  { %2897 = vmatpush3.bf16.msra.mxu0 %v2896_v6  ;;  %v1317_v6 = vld [vmem:[#allocation5] sm:$0xff] }
 0x127   :  { %2898 = vmatprep.subr.bf16.mxu0 %v3255_v20  ;;  %v2974_v13 = vpack.c.bf16 %v1318_v7, %v1317_v6  ;;  %v1341_v7 = vld [vmem:[#allocation5 + $0xc0] sm:$0xff] }
 0x128   :  { %2876 = vmatpush3.bf16.msra.mxu1 %v2875_v9  ;;  %v2950_v9 = vpack.c.bf16 %v756_v4, %v755_v3  ;;  %v1339_v4 = vld [vmem:[#allocation5 + $0xb0] sm:$0xff] }
 0x129   :  { %2901 = vmatprep.subr.bf16.mxu1 %v3255_v20 }
 0x12a   :  { %2900 = vmatpush3.bf16.msra.mxu0 %v2899_v12  ;;  %v3160_v12 = vpop.eup %3159 }
 0x12b   :  { %2418 = vmatmul.mubr.f32.vlgmr.msra.gmra.mrb[8].mxu1 %v3154_v16  ;;  %2925 = vmatprep.subr.bf16.mxu0 %v3255_v20  ;;  %v1320_v16 = vld [vmem:[#allocation5 + $0x18] sm:$0xff] }
 0x12c   :  { %2903 = vmatpush3.bf16.msra.mxu1 %v2902_v17  ;;  %2487 = vmatprep.mubr.msk.f32.mxu1 %vm3254_vm0, %v3253_v0  ;;  %v2953_v17 = vpack.c.bf16 %v758_v11, %v757_v10  ;;  %v1343_v10 = vld [vmem:[#allocation5 + $0xd0] sm:$0xff]  ;;  %v1344_v11 = vld [vmem:[#allocation5 + $0xd8] sm:$0xff] }
 0x12d   :  { %2904 = vmatprep.subr.bf16.mxu1 %v3255_v20  ;;  %2453 = vmatmul.mubr.f32.vlgmr.msra.gmra.mrb[10].mxu0 %v3156_v22  ;;  %v2977_v22 = vpack.c.bf16 %v1320_v16, %v1319_v14  ;;  %v1346_v14 = vld [vmem:[#allocation5 + $0xe8] sm:$0xff] }
 0x12e   :  { %2927 = vmatpush3.bf16.msra.mxu0 %v2926_v23  ;;  %2522 = vmatprep.mubr.msk.f32.mxu0 %vm3254_vm0, %v3253_v0  ;;  %v1321_v23 = vld [vmem:[#allocation5 + $0x20] sm:$0xff] }
 0x12f   :  { %2928 = vmatprep.subr.bf16.mxu0 %v3255_v20  ;;  %v2980_v29 = vpack.c.bf16 %v1322_v24, %v1321_v23  ;;  %v2015_v24 = vld [vmem:[%s3641_s4 + $0x1] ss:$0 sm:$0xff] }
 0x130   :  { %2906 = vmatpush3.bf16.msra.mxu1 %v2905_v27  ;;  %v761_v27 = vld [vmem:[#allocation2 + $0x330] sm:$0xff] }
 0x131   :  { %2907 = vmatprep.subr.bf16.mxu1 %v3255_v20  ;;  %v2959_v32 = vpack.c.bf16 %v762_v28, %v761_v27 }
 0x132   :  { %2930 = vmatpush3.bf16.msra.mxu0 %v2929_v30  ;;  %v1323_v30 = vld [vmem:[#allocation5 + $0x30] sm:$0xff] }
 0x133   :  { %2931 = vmatprep.subr.bf16.mxu0 %v3255_v20  ;;  %v2983_v35 = vpack.c.bf16 %v1324_v31, %v1323_v30  ;;  %v1349_v31 = vld [vmem:[#allocation5 + $0x100] sm:$0xff] }
 0x134   :  { %2909 = vmatpush3.bf16.msra.mxu1 %v2908_v33  ;;  %v763_v33 = vld [vmem:[#allocation2 + $0x340] sm:$0xff] }
 0x135   :  { %2910 = vmatprep.subr.bf16.mxu1 %v3255_v20 }
 0x136   :  { %2933 = vmatpush3.bf16.msra.mxu0 %v2932_v36  ;;  %v1999_v36 = vld [vmem:[%s3639_s2 + $0x6] ss:$0 sm:$0xff] }
 0x137   :  { %2934 = vmatprep.subr.bf16.mxu0 %v3255_v20 }
 0x138   :  { %2912 = vmatpush3.bf16.msra.mxu1 %v2911_v39  ;;  %v2962_v39 = vpack.c.bf16 %v764_v34, %v763_v33  ;;  %v1365_v33 = vld [vmem:[#allocation5 + $0x180] sm:$0xff]  ;;  %v1366_v34 = vld [vmem:[#allocation5 + $0x188] sm:$0xff] }
 0x139   :  { %2913 = vmatprep.subr.bf16.mxu1 %v3255_v20 }
 0x13a   :  { %2936 = vmatpush3.bf16.msra.mxu0 %v2935_v42  ;;  %v649_v42 = vadd.f32 %v1999_v36, %v3440_v25  ;;  %v769_v25 = vld [vmem:[#allocation2 + $0x370] sm:$0xff] }
 0x13b   :  { %2937 = vmatprep.subr.bf16.mxu0 %v3255_v20  ;;  %v1351_v36 = vld [vmem:[#allocation5 + $0x110] sm:$0xff] }
 0x13c   :  { %2915 = vmatpush3.bf16.msra.mxu1 %v2914_v46  ;;  %v768_v46 = vld [vmem:[#allocation2 + $0x368] sm:$0xff]  ;;  %3161 = vtanh.f32 %v649_v42 }
 0x13d   :  { %2916 = vmatprep.subr.bf16.mxu1 %v3255_v20  ;;  %v2968_v50 = vpack.c.bf16 %v768_v46, %v767_v45  ;;  %v1354_v45 = vld [vmem:[#allocation5 + $0x128] sm:$0xff]  ;;  %v3049_v46 = vpack.c.bf16 %v1368_v41, %v1367_v40  ;;  %v1385_v40 = vld [vmem:[#allocation5 + $0x220] sm:$0xff] }
 0x13e   :  { %2939 = vmatpush3.bf16.msra.mxu0 %v2938_v51  ;;  %v770_v51 = vld [vmem:[#allocation2 + $0x378] sm:$0xff]  ;;  %v1386_v41 = vld [vmem:[#allocation5 + $0x228] sm:$0xff] }
 0x13f   :  { %2940 = vmatprep.subr.bf16.mxu0 %v3255_v20  ;;  %v2971_v57 = vpack.c.bf16 %v770_v51, %v769_v25  ;;  %v1356_v25 = vld [vmem:[#allocation5 + $0x138] sm:$0xff]  ;;  %v3052_v51 = vpack.c.bf16 %v1370_v48, %v1369_v47 }
 0x140   :  { %2918 = vmatpush3.bf16.msra.mxu1 %v2917_v54  ;;  %v2992_v54 = vpack.c.bf16 %v1330_v53, %v1329_v52  ;;  %v1371_v52 = vld [vmem:[#allocation5 + $0x1b0] sm:$0xff]  ;;  %v1372_v53 = vld [vmem:[#allocation5 + $0x1b8] sm:$0xff] }
 0x141   :  { %2919 = vmatprep.subr.bf16.mxu1 %v3255_v20  ;;  %v1388_v47 = vld [vmem:[#allocation5 + $0x238] sm:$0xff] }
 0x142   :  { %2942 = vmatpush3.bf16.msra.mxu0 %v2941_v58  ;;  %v1333_v58 = vld [vmem:[#allocation5 + $0x80] sm:$0xff] }
 0x143   :  { %2943 = vmatprep.subr.bf16.mxu0 %v3255_v20  ;;  %v2998_v61 = vpack.c.bf16 %v1334_v15, %v1333_v58  ;;  %v1373_v58 = vld [vmem:[#allocation5 + $0x1c0] sm:$0xff]  ;;  %v1374_v15 = vld [vmem:[#allocation5 + $0x1c8] sm:$0xff] }
 0x144   :  { %2921 = vmatpush3.bf16.msra.mxu1 %v2920_v60 }
 0x145   :  { %2922 = vmatprep.subr.bf16.mxu1 %v3255_v20 }
 0x146   :  { %2945 = vmatpush3.bf16.msra.mxu0 %v2944_v19  ;;  %v3162_v60 = vpop.eup %3161  ;;  %v1336_v19 = vld [vmem:[#allocation5 + $0x98] sm:$0xff] }
 0x147   :  { %2946 = vmatprep.subr.bf16.mxu0 %v3255_v20  ;;  %v3001_v63 = vpack.c.bf16 %v1336_v19, %v1335_v62  ;;  %v3058_v62 = vpack.c.bf16 %v1374_v15, %v1373_v58  ;;  %v2016_v19 = vld [vmem:[%s3641_s4 + $0x2] ss:$0 sm:$0xff]  ;;  %v1392_v58 = vld [vmem:[#allocation5 + $0x258] sm:$0xff] }
 0x148   :  { %2924 = vmatpush3.bf16.msra.mxu1 %v2923_v2  ;;  %v1338_v2 = vld [vmem:[#allocation5 + $0xa8] sm:$0xff] }
 0x149   :  { %2949 = vmatprep.subr.bf16.mxu1 %v3255_v20  ;;  %v3004_v3 = vpack.c.bf16 %v1338_v2, %v1337_v1  ;;  %v1376_v1 = vld [vmem:[#allocation5 + $0x1d8] sm:$0xff] }
 0x14a   :  { %2948 = vmatpush3.bf16.msra.mxu0 %v2947_v5  ;;  %v1340_v5 = vld [vmem:[#allocation5 + $0xb8] sm:$0xff] }
 0x14b   :  { %2488 = vmatmul.mubr.f32.vlgmr.msra.gmra.mrb[10].mxu1 %v3158_v8  ;;  %2973 = vmatprep.subr.bf16.mxu0 %v3255_v20  ;;  %v3007_v6 = vpack.c.bf16 %v1340_v5, %v1339_v4  ;;  %v1342_v8 = vld [vmem:[#allocation5 + $0xc8] sm:$0xff]  ;;  %v1361_v4 = vld [vmem:[#allocation5 + $0x160] sm:$0xff] }
 0x14c   :  { %2951 = vmatpush3.bf16.msra.mxu1 %v2950_v9  ;;  %2557 = vmatprep.mubr.msk.f32.mxu1 %vm3254_vm0, %v3253_v0  ;;  %v3010_v9 = vpack.c.bf16 %v1342_v8, %v1341_v7  ;;  %v1362_v5 = vld [vmem:[#allocation5 + $0x168] sm:$0xff] }
 0x14d   :  { %2952 = vmatprep.subr.bf16.mxu1 %v3255_v20  ;;  %2523 = vmatmul.mubr.f32.vlgmr.msra.gmra.mrb[12].mxu0 %v3160_v12  ;;  %v3013_v12 = vpack.c.bf16 %v1344_v11, %v1343_v10  ;;  %v1377_v11 = vld [vmem:[#allocation5 + $0x1e0] sm:$0xff] }
 0x14e   :  { %2975 = vmatpush3.bf16.msra.mxu0 %v2974_v13  ;;  %2592 = vmatprep.mubr.msk.f32.mxu0 %vm3254_vm0, %v3253_v0  ;;  %v1345_v13 = vld [vmem:[#allocation5 + $0xe0] sm:$0xff] }
 0x14f   :  { %2976 = vmatprep.subr.bf16.mxu0 %v3255_v20  ;;  %v3016_v16 = vpack.c.bf16 %v1346_v14, %v1345_v13  ;;  %v3040_v13 = vpack.c.bf16 %v1362_v5, %v1361_v4 }
 0x150   :  { %2954 = vmatpush3.bf16.msra.mxu1 %v2953_v17  ;;  %v1347_v17 = vld [vmem:[#allocation5 + $0xf0] sm:$0xff] }
 0x151   :  { %2955 = vmatprep.subr.bf16.mxu1 %v3255_v20  ;;  %v3019_v21 = vpack.c.bf16 %v1348_v18, %v1347_v17  ;;  %v1363_v17 = vld [vmem:[#allocation5 + $0x170] sm:$0xff]  ;;  %v1364_v18 = vld [vmem:[#allocation5 + $0x178] sm:$0xff] }
 0x152   :  { %2978 = vmatpush3.bf16.msra.mxu0 %v2977_v22  ;;  %v2014_v22 = vld [vmem:[%s3641_s4] ss:$0 sm:$0xff] }
 0x153   :  { %2979 = vmatprep.subr.bf16.mxu0 %v3255_v20 }
 0x154   :  { %2957 = vmatpush3.bf16.msra.mxu1 %v2956_v26 }
 0x155   :  { %2958 = vmatprep.subr.bf16.mxu1 %v3255_v20 }
 0x156   :  { %2981 = vmatpush3.bf16.msra.mxu0 %v2980_v29 }
 0x157   :  { %2982 = vmatprep.subr.bf16.mxu0 %v3255_v20 }
 0x158   :  { %2960 = vmatpush3.bf16.msra.mxu1 %v2959_v32  ;;  %v1350_v32 = vld [vmem:[#allocation5 + $0x108] sm:$0xff] }
 0x159   :  { %2961 = vmatprep.subr.bf16.mxu1 %v3255_v20 }
 0x15a   :  { %2984 = vmatpush3.bf16.msra.mxu0 %v2983_v35  ;;  %v3022_v35 = vpack.c.bf16 %v1350_v32, %v1349_v31  ;;  %v1383_v32 = vld [vmem:[#allocation5 + $0x210] sm:$0xff] }
 0x15b   :  { %2985 = vmatprep.subr.bf16.mxu0 %v3255_v20 }
 0x15c   :  { %2963 = vmatpush3.bf16.msra.mxu1 %v2962_v39  ;;  %v3046_v39 = vpack.c.bf16 %v1366_v34, %v1365_v33  ;;  %v1384_v33 = vld [vmem:[#allocation5 + $0x218] sm:$0xff] }
 0x15d   :  { %2964 = vmatprep.subr.bf16.mxu1 %v3255_v20 }
 0x15e   :  { %2987 = vmatpush3.bf16.msra.mxu0 %v2986_v43  ;;  %v3025_v43 = vpack.c.bf16 %v1352_v37, %v1351_v36  ;;  %v1399_v36 = vld [vmem:[#allocation5 + $0x290] sm:$0xff]  ;;  %v1400_v37 = vld [vmem:[#allocation5 + $0x298] sm:$0xff] }
 0x15f   :  { %2988 = vmatprep.subr.bf16.mxu0 %v3255_v20 }
 0x160   :  { %2966 = vmatpush3.bf16.msra.mxu1 %v2965_v44  ;;  %v1353_v44 = vld [vmem:[#allocation5 + $0x120] sm:$0xff] }
 0x161   :  { %2967 = vmatprep.subr.bf16.mxu1 %v3255_v20 }
 0x162   :  { %2990 = vmatpush3.bf16.msra.mxu0 %v2989_v49  ;;  %v3028_v49 = vpack.c.bf16 %v1354_v45, %v1353_v44  ;;  %v1402_v44 = vld [vmem:[#allocation5 + $0x2a8] sm:$0xff]  ;;  %v3076_v45 = vpack.c.bf16 %v1386_v41, %v1385_v40  ;;  %v1424_v40 = vld [vmem:[#allocation5 + $0x358] sm:$0xff]  ;;  %v2020_v41 = vld [vmem:[%s3641_s4 + $0x6] ss:$0 sm:$0xff] }
 0x163   :  { %2991 = vmatprep.subr.bf16.mxu0 %v3255_v20 }
 0x164   :  { %2969 = vmatpush3.bf16.msra.mxu1 %v2968_v50  ;;  %v1355_v50 = vld [vmem:[#allocation5 + $0x130] sm:$0xff] }
 0x165   :  { %2970 = vmatprep.subr.bf16.mxu1 %v3255_v20 }
 0x166   :  { %2993 = vmatpush3.bf16.msra.mxu0 %v2992_v54  ;;  %v3031_v54 = vpack.c.bf16 %v1356_v25, %v1355_v50  ;;  %v1404_v50 = vld [vmem:[#allocation5 + $0x2b8] sm:$0xff] }
 0x167   :  { %2994 = vmatprep.subr.bf16.mxu0 %v3255_v20 }
 0x168   :  { %2972 = vmatpush3.bf16.msra.mxu1 %v2971_v57  ;;  %v3055_v57 = vpack.c.bf16 %v1372_v53, %v1371_v52  ;;  %v1390_v52 = vld [vmem:[#allocation5 + $0x248] sm:$0xff] }
 0x169   :  { %2997 = vmatprep.subr.bf16.mxu1 %v3255_v20 }
 0x16a   :  { %2996 = vmatpush3.bf16.msra.mxu0 %v2995_v59  ;;  %v3034_v59 = vpack.c.bf16 %v1358_v56, %v1357_v55  ;;  %v1406_v55 = vld [vmem:[#allocation5 + $0x2c8] sm:$0xff] }
 0x16b   :  { %2558 = vmatmul.mubr.f32.vlgmr.msra.gmra.mrb[12].mxu1 %v3162_v60  ;;  %3021 = vmatprep.subr.bf16.mxu0 %v3255_v20  ;;  %v1359_v60 = vld [vmem:[#allocation5 + $0x150] sm:$0xff] }
 0x16c   :  { %2999 = vmatpush3.bf16.msra.mxu1 %v2998_v61  ;;  %2627 = vmatprep.mubr.msk.f32.mxu1 %vm3254_vm0, %v3253_v0  ;;  %v1360_v61 = vld [vmem:[#allocation5 + $0x158] sm:$0xff] }
 0x16d   :  { %3000 = vmatprep.subr.bf16.mxu1 %v3255_v20  ;;  %v3037_v2 = vpack.c.bf16 %v1360_v61, %v1359_v60  ;;  %v1407_v60 = vld [vmem:[#allocation5 + $0x2d0] sm:$0xff]  ;;  %v1408_v61 = vld [vmem:[#allocation5 + $0x2d8] sm:$0xff] }
 0x16e   :  { %v3109_v5 = vpack.c.bf16 %v1408_v61, %v1407_v60  ;;  %v2024_v60 = vld [vmem:[%s3643_s6 + $0x3] ss:$0 sm:$0xff] }
 0x170   :  { %3002 = vmatpush3.bf16.msra.mxu1 %v3001_v63  ;;  %v1375_v63 = vld [vmem:[#allocation5 + $0x1d0] sm:$0xff] }
 0x171   :  { %3003 = vmatprep.subr.bf16.mxu1 %v3255_v20 }
 0x174   :  { %3005 = vmatpush3.bf16.msra.mxu1 %v3004_v3 }
 0x175   :  { %3006 = vmatprep.subr.bf16.mxu1 %v3255_v20 }
 0x178   :  { %3008 = vmatpush3.bf16.msra.mxu1 %v3007_v6  ;;  %v2017_v6 = vld [vmem:[%s3641_s4 + $0x3] ss:$0 sm:$0xff] }
 0x179   :  { %3009 = vmatprep.subr.bf16.mxu1 %v3255_v20 }
 0x17c   :  { %3011 = vmatpush3.bf16.msra.mxu1 %v3010_v9  ;;  %v3061_v9 = vpack.c.bf16 %v1376_v1, %v1375_v63  ;;  %v1393_v63 = vld [vmem:[#allocation5 + $0x260] sm:$0xff]  ;;  %v1394_v1 = vld [vmem:[#allocation5 + $0x268] sm:$0xff] }
 0x17d   :  { %3012 = vmatprep.subr.bf16.mxu1 %v3255_v20 }
 0x180   :  { %3014 = vmatpush3.bf16.msra.mxu1 %v3013_v12  ;;  %v1378_v12 = vld [vmem:[#allocation5 + $0x1e8] sm:$0xff] }
 0x181   :  { %3015 = vmatprep.subr.bf16.mxu1 %v3255_v20 }
 0x184   :  { %3017 = vmatpush3.bf16.msra.mxu1 %v3016_v16 }
 0x185   :  { %3018 = vmatprep.subr.bf16.mxu1 %v3255_v20 }
 0x188   :  { %3020 = vmatpush3.bf16.msra.mxu1 %v3019_v21  ;;  %v3064_v21 = vpack.c.bf16 %v1378_v12, %v1377_v11  ;;  %v1395_v12 = vld [vmem:[#allocation5 + $0x270] sm:$0xff] }
 0x189   :  { %3045 = vmatprep.subr.bf16.mxu1 %v3255_v20 }
 0x1de   :  { %v886_v23 = vpop.f32.mrb[6].mxu1 }
 0x1df   :  { %v887_v26 = vadd.f32 %v2014_v22, %v886_v23  ;;  %v2349_v27 = vpop.f32.mrb[7].mxu1  ;;  %v1379_v22 = vld [vmem:[#allocation5 + $0x1f0] sm:$0xff]  ;;  %v1380_v23 = vld [vmem:[#allocation5 + $0x1f8] sm:$0xff] }
 0x1e0   :  { %v956_v28 = vpop.f32.mrb[8].mxu0  ;;  %v1382_v27 = vld [vmem:[#allocation5 + $0x208] sm:$0xff] }
 0x1e1   :  { %3163 = vtanh.f32 %v887_v26  ;;  %v957_v29 = vadd.f32 %v2015_v24, %v956_v28  ;;  %v2384_v30 = vpop.f32.mrb[9].mxu0  ;;  %v3043_v24 = vpack.c.bf16 %v1364_v18, %v1363_v17  ;;  %v1381_v26 = vld [vmem:[#allocation5 + $0x200] sm:$0xff]  ;;  %v3067_v28 = vpack.c.bf16 %v1380_v23, %v1379_v22  ;;  %v1412_v17 = vld [vmem:[#allocation5 + $0x2f8] sm:$0xff]  ;;  %v1414_v22 = vld [vmem:[#allocation5 + $0x308] sm:$0xff] }
 0x1e2   :  { %v1398_v30 = vld [vmem:[#allocation5 + $0x288] sm:$0xff]  ;;  %v3070_v31 = vpack.c.bf16 %v1382_v27, %v1381_v26  ;;  %v1415_v26 = vld [vmem:[#allocation5 + $0x310] sm:$0xff]  ;;  %v1416_v27 = vld [vmem:[#allocation5 + $0x318] sm:$0xff] }
 0x1e3   :  { %3165 = vtanh.f32 %v957_v29  ;;  %v1397_v29 = vld [vmem:[#allocation5 + $0x280] sm:$0xff] }
 0x1eb   :  { %v3164_v38 = vpop.eup %3163 }
 0x1ec   :  { %2593 = vmatmul.mubr.f32.vlgmr.msra.gmra.mrb[14].mxu0 %v3164_v38 }
 0x1ed   :  { %v3166_v42 = vpop.eup %3165  ;;  %3023 = vmatpush3.bf16.msra.mxu0 %v3022_v35  ;;  %2662 = vmatprep.mubr.msk.f32.mxu0 %vm3254_vm0, %v3253_v0  ;;  %v3094_v35 = vpack.c.bf16 %v1398_v30, %v1397_v29  ;;  %v3121_v30 = vpack.c.bf16 %v1416_v27, %v1415_v26 }
 0x1ee   :  { %3024 = vmatprep.subr.bf16.mxu0 %v3255_v20  ;;  %2628 = vmatmul.mubr.f32.vlgmr.msra.gmra.mrb[14].mxu1 %v3166_v42  ;;  %v3097_v42 = vpack.c.bf16 %v1400_v37, %v1399_v36  ;;  %v1421_v37 = vld [vmem:[#allocation5 + $0x340] sm:$0xff] }
 0x1ef   :  { %3047 = vmatpush3.bf16.msra.mxu1 %v3046_v39  ;;  %2697 = vmatprep.mubr.msk.f32.mxu1 %vm3254_vm0, %v3253_v0  ;;  %v3073_v39 = vpack.c.bf16 %v1384_v33, %v1383_v32  ;;  %v1418_v32 = vld [vmem:[#allocation5 + $0x328] sm:$0xff] }
 0x1f0   :  { %3048 = vmatprep.subr.bf16.mxu1 %v3255_v20 }
 0x1f1   :  { %3026 = vmatpush3.bf16.msra.mxu0 %v3025_v43  ;;  %v1401_v43 = vld [vmem:[#allocation5 + $0x2a0] sm:$0xff] }
 0x1f2   :  { %3027 = vmatprep.subr.bf16.mxu0 %v3255_v20  ;;  %v3100_v48 = vpack.c.bf16 %v1402_v44, %v1401_v43  ;;  %v1425_v44 = vld [vmem:[#allocation5 + $0x360] sm:$0xff] }
 0x1f3   :  { %3050 = vmatpush3.bf16.msra.mxu1 %v3049_v46  ;;  %v1387_v46 = vld [vmem:[#allocation5 + $0x230] sm:$0xff] }
 0x1f4   :  { %3051 = vmatprep.subr.bf16.mxu1 %v3255_v20  ;;  %v3079_v25 = vpack.c.bf16 %v1388_v47, %v1387_v46 }
 0x1f5   :  { %3029 = vmatpush3.bf16.msra.mxu0 %v3028_v49  ;;  %v1403_v49 = vld [vmem:[#allocation5 + $0x2b0] sm:$0xff] }
 0x1f6   :  { %3030 = vmatprep.subr.bf16.mxu0 %v3255_v20  ;;  %v3103_v53 = vpack.c.bf16 %v1404_v50, %v1403_v49  ;;  %v1427_v49 = vld [vmem:[#allocation5 + $0x370] sm:$0xff]  ;;  %v1428_v50 = vld [vmem:[#allocation5 + $0x378] sm:$0xff] }
 0x1f7   :  { %3053 = vmatpush3.bf16.msra.mxu1 %v3052_v51  ;;  %v1389_v51 = vld [vmem:[#allocation5 + $0x240] sm:$0xff] }
 0x1f8   :  { %3054 = vmatprep.subr.bf16.mxu1 %v3255_v20  ;;  %v3082_v56 = vpack.c.bf16 %v1390_v52, %v1389_v51  ;;  %v2021_v52 = vld [vmem:[%s3643_s6] ss:$0 sm:$0xff] }
 0x1f9   :  { %3032 = vmatpush3.bf16.msra.mxu0 %v3031_v54  ;;  %v1405_v54 = vld [vmem:[#allocation5 + $0x2c0] sm:$0xff] }
 0x1fa   :  { %3033 = vmatprep.subr.bf16.mxu0 %v3255_v20  ;;  %v3106_v15 = vpack.c.bf16 %v1406_v55, %v1405_v54  ;;  %v2022_v54 = vld [vmem:[%s3643_s6 + $0x1] ss:$0 sm:$0xff] }
 0x1fb   :  { %3056 = vmatpush3.bf16.msra.mxu1 %v3055_v57  ;;  %v1391_v57 = vld [vmem:[#allocation5 + $0x250] sm:$0xff] }
 0x1fc   :  { %3057 = vmatprep.subr.bf16.mxu1 %v3255_v20 }
 0x1fd   :  { %3035 = vmatpush3.bf16.msra.mxu0 %v3034_v59  ;;  %v2018_v59 = vld [vmem:[%s3641_s4 + $0x4] ss:$0 sm:$0xff] }
 0x1fe   :  { %v1026_v3 = vpop.f32.mrb[8].mxu1  ;;  %3036 = vmatprep.subr.bf16.mxu0 %v3255_v20 }
 0x1ff   :  { %v1027_v7 = vadd.f32 %v2016_v19, %v1026_v3  ;;  %v2419_v8 = vpop.f32.mrb[9].mxu1  ;;  %3059 = vmatpush3.bf16.msra.mxu1 %v3058_v62  ;;  %v3085_v62 = vpack.c.bf16 %v1392_v58, %v1391_v57 }
 0x200   :  { %v1096_v10 = vpop.f32.mrb[10].mxu0  ;;  %3060 = vmatprep.subr.bf16.mxu1 %v3255_v20  ;;  %v1410_v8 = vld [vmem:[#allocation5 + $0x2e8] sm:$0xff] }
 0x201   :  { %3167 = vtanh.f32 %v1027_v7  ;;  %3038 = vmatpush3.bf16.msra.mxu0 %v3037_v2  ;;  %v1097_v14 = vadd.f32 %v2017_v6, %v1096_v10  ;;  %v2454_v16 = vpop.f32.mrb[11].mxu0  ;;  %v2019_v2 = vld [vmem:[%s3641_s4 + $0x5] ss:$0 sm:$0xff] }
 0x202   :  { %3039 = vmatprep.subr.bf16.mxu0 %v3255_v20  ;;  %v1409_v7 = vld [vmem:[#allocation5 + $0x2e0] sm:$0xff]  ;;  %v1411_v16 = vld [vmem:[#allocation5 + $0x2f0] sm:$0xff] }
 0x203   :  { %3169 = vtanh.f32 %v1097_v14  ;;  %3062 = vmatpush3.bf16.msra.mxu1 %v3061_v9  ;;  %v3088_v9 = vpack.c.bf16 %v1394_v1, %v1393_v63  ;;  %v3112_v14 = vpack.c.bf16 %v1410_v8, %v1409_v7  ;;  %v3115_v23 = vpack.c.bf16 %v1412_v17, %v1411_v16 }
 0x204   :  { %3063 = vmatprep.subr.bf16.mxu1 %v3255_v20 }
 0x205   :  { %3041 = vmatpush3.bf16.msra.mxu0 %v3040_v13  ;;  %v1396_v13 = vld [vmem:[#allocation5 + $0x278] sm:$0xff] }
 0x206   :  { %3042 = vmatprep.subr.bf16.mxu0 %v3255_v20  ;;  %v3091_v18 = vpack.c.bf16 %v1396_v13, %v1395_v12 }
 0x207   :  { %3065 = vmatpush3.bf16.msra.mxu1 %v3064_v21  ;;  %v1413_v21 = vld [vmem:[#allocation5 + $0x300] sm:$0xff] }
 0x208   :  { %3066 = vmatprep.subr.bf16.mxu1 %v3255_v20 }
 0x209   :  { %3044 = vmatpush3.bf16.msra.mxu0 %v3043_v24  ;;  %v3118_v24 = vpack.c.bf16 %v1414_v22, %v1413_v21 }
 0x20a   :  { %3069 = vmatprep.subr.bf16.mxu0 %v3255_v20 }
 0x20b   :  { %v3168_v34 = vpop.eup %3167  ;;  %3068 = vmatpush3.bf16.msra.mxu1 %v3067_v28 }
 0x20c   :  { %2663 = vmatmul.mubr.f32.vlgmr.msra.gmra.mrb[16].mxu0 %v3168_v34  ;;  %3093 = vmatprep.subr.bf16.mxu1 %v3255_v20  ;;  %v1419_v34 = vld [vmem:[#allocation5 + $0x330] sm:$0xff] }
 0x20d   :  { %v3170_v38 = vpop.eup %3169  ;;  %3071 = vmatpush3.bf16.msra.mxu0 %v3070_v31  ;;  %2732 = vmatprep.mubr.msk.f32.mxu0 %vm3254_vm0, %v3253_v0  ;;  %v1417_v31 = vld [vmem:[#allocation5 + $0x320] sm:$0xff] }
 0x20e   :  { %3072 = vmatprep.subr.bf16.mxu0 %v3255_v20  ;;  %2698 = vmatmul.mubr.f32.vlgmr.msra.gmra.mrb[16].mxu1 %v3170_v38  ;;  %v3124_v33 = vpack.c.bf16 %v1418_v32, %v1417_v31  ;;  %v1422_v38 = vld [vmem:[#allocation5 + $0x348] sm:$0xff] }
 0x20f   :  { %3095 = vmatpush3.bf16.msra.mxu1 %v3094_v35  ;;  %2767 = vmatprep.mubr.msk.f32.mxu1 %vm3254_vm0, %v3253_v0  ;;  %v1420_v35 = vld [vmem:[#allocation5 + $0x338] sm:$0xff] }
 0x210   :  { %3096 = vmatprep.subr.bf16.mxu1 %v3255_v20  ;;  %v3127_v36 = vpack.c.bf16 %v1420_v35, %v1419_v34 }
 0x211   :  { %3074 = vmatpush3.bf16.msra.mxu0 %v3073_v39  ;;  %v3130_v39 = vpack.c.bf16 %v1422_v38, %v1421_v37 }
 0x212   :  { %3075 = vmatprep.subr.bf16.mxu0 %v3255_v20 }
 0x213   :  { %3098 = vmatpush3.bf16.msra.mxu1 %v3097_v42 }
 0x214   :  { %3099 = vmatprep.subr.bf16.mxu1 %v3255_v20 }
 0x215   :  { %3077 = vmatpush3.bf16.msra.mxu0 %v3076_v45  ;;  %v1426_v45 = vld [vmem:[#allocation5 + $0x368] sm:$0xff] }
 0x216   :  { %3078 = vmatprep.subr.bf16.mxu0 %v3255_v20 }
 0x217   :  { %3101 = vmatpush3.bf16.msra.mxu1 %v3100_v48  ;;  %v3136_v48 = vpack.c.bf16 %v1426_v45, %v1425_v44 }
 0x218   :  { %3102 = vmatprep.subr.bf16.mxu1 %v3255_v20 }
 0x219   :  { %3080 = vmatpush3.bf16.msra.mxu0 %v3079_v25  ;;  %v3139_v25 = vpack.c.bf16 %v1428_v50, %v1427_v49 }
 0x21a   :  { %3081 = vmatprep.subr.bf16.mxu0 %v3255_v20 }
 0x21b   :  { %3104 = vmatpush3.bf16.msra.mxu1 %v3103_v53 }
 0x21c   :  { %3105 = vmatprep.subr.bf16.mxu1 %v3255_v20 }
 0x21d   :  { %3083 = vmatpush3.bf16.msra.mxu0 %v3082_v56 }
 0x21e   :  { %v1166_v19 = vpop.f32.mrb[10].mxu1  ;;  %3084 = vmatprep.subr.bf16.mxu0 %v3255_v20 }
 0x21f   :  { %v1167_v3 = vadd.f32 %v2018_v59, %v1166_v19  ;;  %v2489_v4 = vpop.f32.mrb[11].mxu1  ;;  %3107 = vmatpush3.bf16.msra.mxu1 %v3106_v15 }
 0x220   :  { %v1236_v6 = vpop.f32.mrb[12].mxu0  ;;  %3108 = vmatprep.subr.bf16.mxu1 %v3255_v20  ;;  %v2026_v4 = vld [vmem:[%s3643_s6 + $0x5] ss:$0 sm:$0xff] }
 0x221   :  { %3171 = vtanh.f32 %v1167_v3  ;;  %3086 = vmatpush3.bf16.msra.mxu0 %v3085_v62  ;;  %v1237_v10 = vadd.f32 %v2019_v2, %v1236_v6  ;;  %v2524_v11 = vpop.f32.mrb[13].mxu0  ;;  %v2025_v2 = vld [vmem:[%s3643_s6 + $0x4] ss:$0 sm:$0xff] }
 0x222   :  { %3087 = vmatprep.subr.bf16.mxu0 %v3255_v20 }
 0x223   :  { %3173 = vtanh.f32 %v1237_v10  ;;  %3110 = vmatpush3.bf16.msra.mxu1 %v3109_v5  ;;  %v2027_v10 = vld [vmem:[%s3643_s6 + $0x6] ss:$0 sm:$0xff] }
 0x224   :  { %3111 = vmatprep.subr.bf16.mxu1 %v3255_v20 }
 0x225   :  { %3089 = vmatpush3.bf16.msra.mxu0 %v3088_v9 }
 0x226   :  { %3090 = vmatprep.subr.bf16.mxu0 %v3255_v20 }
 0x227   :  { %3113 = vmatpush3.bf16.msra.mxu1 %v3112_v14 }
 0x228   :  { %3114 = vmatprep.subr.bf16.mxu1 %v3255_v20 }
 0x229   :  { %3092 = vmatpush3.bf16.msra.mxu0 %v3091_v18 }
 0x22a   :  { %3117 = vmatprep.subr.bf16.mxu0 %v3255_v20 }
 0x22b   :  { %v3172_v28 = vpop.eup %3171  ;;  %3116 = vmatpush3.bf16.msra.mxu1 %v3115_v23 }
 0x22c   :  { %2733 = vmatmul.mubr.f32.vlgmr.msra.gmra.mrb[18].mxu0 %v3172_v28 }
 0x22d   :  { %v3174_v29 = vpop.eup %3173  ;;  %3119 = vmatpush3.bf16.msra.mxu0 %v3118_v24  ;;  %2802 = vmatprep.mubr.msk.f32.mxu0 %vm3254_vm0, %v3253_v0  ;;  %v1423_v0 = vld [vmem:[#allocation5 + $0x350] sm:$0xff] }
 0x22e   :  { %3120 = vmatprep.subr.bf16.mxu0 %v3255_v20  ;;  %2768 = vmatmul.mubr.f32.vlgmr.msra.gmra.mrb[18].mxu1 %v3174_v29  ;;  %v3133_v42 = vpack.c.bf16 %v1424_v40, %v1423_v0 }
 0x231   :  { %3122 = vmatpush3.bf16.msra.mxu0 %v3121_v30 }
 0x232   :  { %3123 = vmatprep.subr.bf16.mxu0 %v3255_v20 }
 0x235   :  { %3125 = vmatpush3.bf16.msra.mxu0 %v3124_v33 }
 0x236   :  { %3126 = vmatprep.subr.bf16.mxu0 %v3255_v20 }
 0x239   :  { %3128 = vmatpush3.bf16.msra.mxu0 %v3127_v36 }
 0x23a   :  { %3129 = vmatprep.subr.bf16.mxu0 %v3255_v20 }
 0x23d   :  { %3131 = vmatpush3.bf16.msra.mxu0 %v3130_v39 }
 0x23e   :  { %v1306_v43 = vpop.f32.mrb[12].mxu1  ;;  %3132 = vmatprep.subr.bf16.mxu0 %v3255_v20 }
 0x23f   :  { %v1307_v46 = vadd.f32 %v2020_v41, %v1306_v43  ;;  %v2559_v47 = vpop.f32.mrb[13].mxu1 }
 0x241   :  { %3175 = vtanh.f32 %v1307_v46  ;;  %3134 = vmatpush3.bf16.msra.mxu0 %v3133_v42 }
 0x242   :  { %3135 = vmatprep.subr.bf16.mxu0 %v3255_v20 }
 0x245   :  { %3137 = vmatpush3.bf16.msra.mxu0 %v3136_v48 }
 0x246   :  { %3138 = vmatprep.subr.bf16.mxu0 %v3255_v20  ;;  %v2023_v20 = vld [vmem:[%s3643_s6 + $0x2] ss:$0 sm:$0xff] }
 0x249   :  { %3140 = vmatpush3.bf16.msra.mxu0 %v3139_v25 }
 0x24b   :  { %v3176_v51 = vpop.eup %3175 }
 0x24c   :  { %2803 = vmatmul.mubr.f32.vlgmr.msra.gmra.mrb[20].mxu0 %v3176_v51 }
 0x2bf   :  { %v1544_v53 = vpop.f32.mrb[14].mxu0 }
 0x2c0   :  { %v1545_v55 = vadd.f32 %v2021_v52, %v1544_v53  ;;  %v2594_v56 = vpop.f32.mrb[15].mxu0 }
 0x2c1   :  { %v1614_v57 = vpop.f32.mrb[14].mxu1 }
 0x2c2   :  { %1968 = vst [vmem:[#allocation7] sm:$0xff] %v1545_v55  ;;  %v1615_v58 = vadd.f32 %v2022_v54, %v1614_v57  ;;  %v2629_v15 = vpop.f32.mrb[15].mxu1 }
 0x2c4   :  { %1969 = vst [vmem:[#allocation7 + $0x8] sm:$0xff] %v1615_v58 }
 0x2df   :  { %v1684_v59 = vpop.f32.mrb[16].mxu0 }
 0x2e0   :  { %v1685_v61 = vadd.f32 %v2023_v20, %v1684_v59  ;;  %v2664_v62 = vpop.f32.mrb[17].mxu0 }
 0x2e1   :  { %v1754_v19 = vpop.f32.mrb[16].mxu1 }
 0x2e2   :  { %1970 = vst [vmem:[#allocation7 + $0x10] sm:$0xff] %v1685_v61  ;;  %v1755_v63 = vadd.f32 %v2024_v60, %v1754_v19  ;;  %v2699_v1 = vpop.f32.mrb[17].mxu1 }
 0x2e4   :  { %1971 = vst [vmem:[#allocation7 + $0x18] sm:$0xff] %v1755_v63 }
 0x2ff   :  { %v1824_v3 = vpop.f32.mrb[18].mxu0 }
 0x300   :  { %v1825_v5 = vadd.f32 %v2025_v2, %v1824_v3  ;;  %v2734_v6 = vpop.f32.mrb[19].mxu0 }
 0x301   :  { %v1894_v7 = vpop.f32.mrb[18].mxu1 }
 0x302   :  { %1972 = vst [vmem:[#allocation7 + $0x20] sm:$0xff] %v1825_v5  ;;  %v1895_v8 = vadd.f32 %v2026_v4, %v1894_v7  ;;  %v2769_v9 = vpop.f32.mrb[19].mxu1 }
 0x304   :  { %1973 = vst [vmem:[#allocation7 + $0x28] sm:$0xff] %v1895_v8 }
 0x31f   :  { %v1964_v11 = vpop.f32.mrb[20].mxu0 }
 0x320   :  { %v1965_v12 = vadd.f32 %v2027_v10, %v1964_v11  ;;  %v2804_v13 = vpop.f32.mrb[21].mxu0 }
 0x322   :  { %1974 = vst [vmem:[#allocation7 + $0x30] sm:$0xff] %v1965_v12 }
 0x323   :  { %3232 = shalt.err (!%p3229_p6)
}
 0x324   :  { %s3233_s25 = scalar_lea.hbm %s3644_s7, 896 }
 0x325   :  { %p3234_p7 = scmp.ne.s32.totalorder %s3644_s7, %s3233_s25  ;;  %p3237_p8 = scmp.lt.u32.totalorder %s3233_s25, %s3644_s7 }
 0x327   :  { %p3239_p9 = pnand %p3237_p8, %p3234_p7 }
 0x329   :  { %3242 = shalt.err (!%p3239_p9)
}
 0x32a   :  { %1986 = dma.vmem_to_hbm [thread:$0]  %s1981_s22, 896, %s3644_s7, [#allocation4], %s3250_s11, %s3250_s11, %s3251_s12  }
 0x32b   :  { %3247 = dma.done.wait [#allocation4], 896  }
 0x32c   :  { %3248 = vsyncadd [#allocation4], 4294966400 }
 0x32d   :  { %1990 = vsyncpa [#allocation3], 1 }
 0x32e   :  { %1991 = vsyncpa [#allocation6], 1 }
 0x32f   :  { %1992 = vsyncpa [#allocation4], 1 }

// kernel: tpu_custom_call.1
= control target key start
LH: loop header
LB: loop body
LE: loop exit
PB: predicated region body
PF: predicated region fallthrough
CT: control target
= control target key end

     0   :  { %12 = vsyncpa [#allocation3], 0  ;;  %s3637_s0 = inlined_call_operand.vmem [shape: f32[7,8,4], index: 0, kind: input, shape index: {}]   ;;  %s3638_s1 = inlined_call_operand.vmem [shape: f32[7,4,128], index: 1, kind: input, shape index: {}]   ;;  %s3639_s2 = inlined_call_operand.vmem [shape: f32[7,1,128], index: 2, kind: input, shape index: {}]   ;;  %s3640_s3 = inlined_call_operand.hbm [shape: f32[7,128,128], index: 3, kind: input, shape index: {}]   ;;  %s3641_s4 = inlined_call_operand.vmem [shape: f32[7,1,128], index: 4, kind: input, shape index: {}]   ;;  %s3642_s5 = inlined_call_operand.hbm [shape: f32[7,128,128], index: 5, kind: input, shape index: {}]   ;;  %s3643_s6 = inlined_call_operand.vmem [shape: f32[7,1,128], index: 6, kind: input, shape index: {}]   ;;  %s3644_s7 = inlined_call_operand.hbm [shape: f32[7,8,128], index: 7, kind: output, shape index: {}]  }
   0x1   :  { %13 = vsyncpa [#allocation6], 0 }
   0x2   :  { %14 = vsyncpa [#allocation4], 0  ;;  %s3249_s24 = smov [#allocation2]   ;;  %s3177_s28 = scalar_lea.hbm %s3640_s3, 14336 }
   0x3   :  { %s26_s25 = sshll.u32 %s3249_s24, 4  ;;  %p3178_p0 = scmp.ne.s32.totalorder %s3640_s3, %s3177_s28  ;;  %s27_s25 = int_to_ptr.vmem [resolvable:$true] %s26_s25 }
   0x4   :  { %p3181_p1 = scmp.lt.u32.totalorder %s3177_s28, %s3640_s3 }
   0x6   :  { %p3183_p2 = pnand %p3181_p1, %p3178_p0 }
   0x8   :  { %3186 = shalt.err (!%p3183_p2)
}
   0x9   :  { %s3187_s10 = scalar_lea.vmem %s27_s25, 14336  ;;  %p3192_p4 = scmp.lt.s32.totalorder %s27_s25, %s27_s25 }
   0xa   :  { %p3188_p3 = scmp.ne.s32.totalorder %s27_s25, %s3187_s10  ;;  %p3193_p5 = scmp.lt.s32.totalorder %s3187_s10, %s3187_s10 }
   0xc   :  { %p3194_p6 = por %p3193_p5, %p3192_p4 }
   0xe   :  { %p3195_p7 = pnand %p3194_p6, %p3188_p3 }
  0x10   :  { %3198 = shalt.err (!%p3195_p7)
}
  0x11   :  { %s3250_s11 = smov 128   ;;  %s3251_s12 = smov 8  }
  0x12   :  { %32 = dma.hbm_to_vmem [thread:$0]  %s3640_s3, 14336, %s27_s25, [#allocation3], %s3250_s11, %s3250_s11, %s3251_s12  }
  0x13   :  { %s3252_s15 = smov [#allocation5]   ;;  %s3199_s19 = scalar_lea.hbm %s3642_s5, 14336 }
  0x14   :  { %s40_s16 = sshll.u32 %s3252_s15, 4  ;;  %p3200_p8 = scmp.ne.s32.totalorder %s3642_s5, %s3199_s19  ;;  %s41_s16 = int_to_ptr.vmem [resolvable:$true] %s40_s16 }
  0x15   :  { %p3203_p9 = scmp.lt.u32.totalorder %s3199_s19, %s3642_s5 }
  0x17   :  { %p3205_p10 = pnand %p3203_p9, %p3200_p8 }
  0x19   :  { %3208 = shalt.err (!%p3205_p10)
}
  0x1a   :  { %s3209_s24 = scalar_lea.vmem %s41_s16, 14336  ;;  %p3214_p12 = scmp.lt.s32.totalorder %s41_s16, %s41_s16 }
  0x1b   :  { %p3210_p11 = scmp.ne.s32.totalorder %s41_s16, %s3209_s24  ;;  %p3215_p13 = scmp.lt.s32.totalorder %s3209_s24, %s3209_s24 }
  0x1d   :  { %p3216_p0 = por %p3215_p13, %p3214_p12 }
  0x1f   :  { %p3217_p1 = pnand %p3216_p0, %p3210_p11 }
  0x21   :  { %3220 = shalt.err (!%p3217_p1)
}
  0x22   :  { %46 = dma.hbm_to_vmem [thread:$0]  %s3642_s5, 14336, %s41_s16, [#allocation6], %s3250_s11, %s3250_s11, %s3251_s12  }
  0x23   :  { %3243 = dma.done.wait [#allocation3], 14336  }
  0x24   :  { %3244 = vsyncadd [#allocation3], 4294952960 }
  0x25   :  { %3245 = dma.done.wait [#allocation6], 14336  }
  0x26   :  { %3246 = vsyncadd [#allocation6], 4294952960  ;;  %v3253_v0 = vmov 0.0   ;;  %vm3254_vm0 = vmmov 0   ;;  %vm122_vm1 = vcmask 1043456   ;;  %vm118_vm2 = vcmask 31744  }
  0x27   :  { %2280 = vmatprep.subr.mxu0 %v3253_v0  ;;  %2282 = vmatprep.mubr.msk.f32.mxu0 %vm3254_vm0, %v3253_v0  ;;  %v62_v1 = vld [vmem:[%s3638_s1] sm:$0xf]  ;;  %v64_v3 = vld [vmem:[%s3638_s1 + $0x8] sm:$0xf]  ;;  %v63_v4 = vld [vmem:[%s3638_s1 + $0x4] sm:$0xf] }
  0x28   :  { %2285 = vmatprep.subr.mxu1 %v3253_v0  ;;  %2287 = vmatprep.mubr.msk.f32.mxu1 %vm3254_vm0, %v3253_v0  ;;  %v55_v2 = vld [vmem:[%s3637_s0] sm:$0xff]  ;;  %v56_v5 = vld [vmem:[%s3637_s0 + $0x8] sm:$0xff]  ;;  %v57_v6 = vld [vmem:[%s3637_s0 + $0x10] sm:$0xff]  ;;  %v3255_v20 = vmov 0.0|0.0   ;;  %s3256_s21 = smov [#allocation7]  }
  0x29   :  { %2281 = vmatpush3.msk.msra.mxu0 %vm122_vm1, %v62_v1  ;;  %2286 = vmatpush3.msk.msra.mxu1 %vm122_vm1, %v63_v4  ;;  %v65_v7 = vld [vmem:[%s3638_s1 + $0xc] sm:$0xf]  ;;  %v66_v8 = vld [vmem:[%s3638_s1 + $0x10] sm:$0xf]  ;;  %v58_v9 = vld [vmem:[%s3637_s0 + $0x18] sm:$0xff]  ;;  %s1980_s22 = sshll.u32 %s3256_s21, 4  ;;  %s1981_s22 = int_to_ptr.vmem [resolvable:$true] %s1980_s22 }
  0x2a   :  { %2283 = vmatmul.mubr.msk.f32.vlgmr.msra.gmra.mrb[0].mxu0 %vm118_vm2, %v55_v2  ;;  %2290 = vmatprep.subr.mxu0 %v3253_v0  ;;  %v59_v10 = vld [vmem:[%s3637_s0 + $0x20] sm:$0xff]  ;;  %v67_v11 = vld [vmem:[%s3638_s1 + $0x14] sm:$0xf]  ;;  %v660_v13 = vld [vmem:[#allocation2 + $0x8] sm:$0xff]  ;;  %s3221_s23 = scalar_lea.vmem %s1981_s22, 896  ;;  %p3226_p3 = scmp.lt.s32.totalorder %s1981_s22, %s1981_s22 }
  0x2b   :  { %2291 = vmatpush3.msk.msra.mxu0 %vm122_vm1, %v64_v3  ;;  %2292 = vmatprep.mubr.msk.f32.mxu0 %vm3254_vm0, %v3253_v0  ;;  %v659_v12 = vld [vmem:[#allocation2] sm:$0xff]  ;;  %v68_v14 = vld [vmem:[%s3638_s1 + $0x18] sm:$0xf]  ;;  %v60_v15 = vld [vmem:[%s3637_s0 + $0x28] sm:$0xff]  ;;  %p3222_p2 = scmp.ne.s32.totalorder %s1981_s22, %s3221_s23  ;;  %p3227_p4 = scmp.lt.s32.totalorder %s3221_s23, %s3221_s23 }
  0x2c   :  { %2288 = vmatmul.mubr.msk.f32.vlgmr.msra.gmra.mrb[0].mxu1 %vm118_vm2, %v56_v5  ;;  %2295 = vmatprep.subr.mxu1 %v3253_v0  ;;  %v2806_v16 = vpack.c.bf16 %v660_v13, %v659_v12  ;;  %v61_v17 = vld [vmem:[%s3637_s0 + $0x30] sm:$0xff]  ;;  %v662_v19 = vld [vmem:[#allocation2 + $0x18] sm:$0xff]  ;;  %v663_v22 = vld [vmem:[#allocation2 + $0x20] sm:$0xff] }
  0x2d   :  { %2300 = vmatprep.subr.mxu0 %v3253_v0  ;;  %2296 = vmatpush3.msk.msra.mxu1 %vm122_vm1, %v65_v7  ;;  %v661_v18 = vld [vmem:[#allocation2 + $0x10] sm:$0xff]  ;;  %v664_v23 = vld [vmem:[#allocation2 + $0x28] sm:$0xff]  ;;  %v666_v26 = vld [vmem:[#allocation2 + $0x38] sm:$0xff]  ;;  %p3228_p5 = por %p3227_p4, %p3226_p3 }
  0x2e   :  { %2293 = vmatmul.mubr.msk.f32.vlgmr.msra.gmra.mrb[2].mxu0 %vm118_vm2, %v57_v6  ;;  %2297 = vmatprep.mubr.msk.f32.mxu1 %vm3254_vm0, %v3253_v0  ;;  %v2809_v21 = vpack.c.bf16 %v662_v19, %v661_v18  ;;  %v2812_v24 = vpack.c.bf16 %v664_v23, %v663_v22  ;;  %v665_v25 = vld [vmem:[#allocation2 + $0x30] sm:$0xff]  ;;  %v667_v28 = vld [vmem:[#allocation2 + $0x40] sm:$0xff]  ;;  %v668_v29 = vld [vmem:[#allocation2 + $0x48] sm:$0xff] }
  0x2f   :  { %2301 = vmatpush3.msk.msra.mxu0 %vm122_vm1, %v66_v8  ;;  %2302 = vmatprep.mubr.msk.f32.mxu0 %vm3254_vm0, %v3253_v0  ;;  %v2815_v27 = vpack.c.bf16 %v666_v26, %v665_v25  ;;  %v2818_v30 = vpack.c.bf16 %v668_v29, %v667_v28  ;;  %v669_v31 = vld [vmem:[#allocation2 + $0x50] sm:$0xff]  ;;  %v670_v32 = vld [vmem:[#allocation2 + $0x58] sm:$0xff]  ;;  %v671_v34 = vld [vmem:[#allocation2 + $0x60] sm:$0xff]  ;;  %p3229_p6 = pnand %p3228_p5, %p3222_p2 }
  0x30   :  { %2298 = vmatmul.mubr.msk.f32.vlgmr.msra.gmra.mrb[2].mxu1 %vm118_vm2, %v58_v9  ;;  %2305 = vmatprep.subr.mxu1 %v3253_v0  ;;  %v2821_v33 = vpack.c.bf16 %v670_v32, %v669_v31  ;;  %v672_v35 = vld [vmem:[#allocation2 + $0x68] sm:$0xff]  ;;  %v673_v36 = vld [vmem:[#allocation2 + $0x70] sm:$0xff]  ;;  %v674_v38 = vld [vmem:[#allocation2 + $0x78] sm:$0xff] }
  0x31   :  { %2310 = vmatprep.subr.mxu0 %v3253_v0  ;;  %2306 = vmatpush3.msk.msra.mxu1 %vm122_vm1, %v67_v11  ;;  %v2824_v37 = vpack.c.bf16 %v672_v35, %v671_v34  ;;  %v675_v39 = vld [vmem:[#allocation2 + $0x80] sm:$0xff]  ;;  %v676_v40 = vld [vmem:[#allocation2 + $0x88] sm:$0xff]  ;;  %v2827_v42 = vpack.c.bf16 %v674_v38, %v673_v36  ;;  %v677_v43 = vld [vmem:[#allocation2 + $0x90] sm:$0xff] }
  0x32   :  { %2303 = vmatmul.mubr.msk.f32.vlgmr.msra.gmra.mrb[4].mxu0 %vm118_vm2, %v59_v10  ;;  %2307 = vmatprep.mubr.msk.f32.mxu1 %vm3254_vm0, %v3253_v0  ;;  %v2830_v41 = vpack.c.bf16 %v676_v40, %v675_v39  ;;  %v678_v44 = vld [vmem:[#allocation2 + $0x98] sm:$0xff]  ;;  %v679_v46 = vld [vmem:[#allocation2 + $0xa0] sm:$0xff]  ;;  %v680_v47 = vld [vmem:[#allocation2 + $0xa8] sm:$0xff] }
  0x33   :  { %2311 = vmatpush3.msk.msra.mxu0 %vm122_vm1, %v68_v14  ;;  %2312 = vmatprep.mubr.msk.f32.mxu0 %vm3254_vm0, %v3253_v0  ;;  %v2833_v45 = vpack.c.bf16 %v678_v44, %v677_v43  ;;  %v2836_v48 = vpack.c.bf16 %v680_v47, %v679_v46  ;;  %v681_v49 = vld [vmem:[#allocation2 + $0xb0] sm:$0xff]  ;;  %v682_v50 = vld [vmem:[#allocation2 + $0xb8] sm:$0xff]  ;;  %v683_v52 = vld [vmem:[#allocation2 + $0xc0] sm:$0xff] }
  0x34   :  { %2308 = vmatmul.mubr.msk.f32.vlgmr.msra.gmra.mrb[4].mxu1 %vm118_vm2, %v60_v15  ;;  %2805 = vmatprep.subr.bf16.mxu1 %v3255_v20  ;;  %v2839_v51 = vpack.c.bf16 %v682_v50, %v681_v49  ;;  %v684_v53 = vld [vmem:[#allocation2 + $0xc8] sm:$0xff]  ;;  %v685_v55 = vld [vmem:[#allocation2 + $0xd0] sm:$0xff]  ;;  %v686_v56 = vld [vmem:[#allocation2 + $0xd8] sm:$0xff] }
  0x35   :  { %2829 = vmatprep.subr.bf16.mxu0 %v3255_v20  ;;  %2807 = vmatpush3.bf16.msra.mxu1 %v2806_v16  ;;  %v2842_v54 = vpack.c.bf16 %v684_v53, %v683_v52  ;;  %v2845_v57 = vpack.c.bf16 %v686_v56, %v685_v55  ;;  %v687_v58 = vld [vmem:[#allocation2 + $0xe0] sm:$0xff]  ;;  %v688_v59 = vld [vmem:[#allocation2 + $0xe8] sm:$0xff]  ;;  %v689_v61 = vld [vmem:[#allocation2 + $0xf0] sm:$0xff] }
  0x36   :  { %2313 = vmatmul.mubr.msk.f32.vlgmr.msra.gmra.mrb[6].mxu0 %vm118_vm2, %v61_v17  ;;  %2808 = vmatprep.subr.bf16.mxu1 %v3255_v20  ;;  %v2848_v60 = vpack.c.bf16 %v688_v59, %v687_v58  ;;  %v690_v62 = vld [vmem:[#allocation2 + $0xf8] sm:$0xff]  ;;  %v1993_v1 = vld [vmem:[%s3639_s2] ss:$0 sm:$0xff]  ;;  %v1994_v3 = vld [vmem:[%s3639_s2 + $0x1] ss:$0 sm:$0xff] }
  0x37   :  { %2347 = vmatprep.mubr.msk.f32.mxu1 %vm3254_vm0, %v3253_v0  ;;  %2382 = vmatprep.mubr.msk.f32.mxu0 %vm3254_vm0, %v3253_v0  ;;  %v2851_v63 = vpack.c.bf16 %v690_v62, %v689_v61  ;;  %v691_v13 = vld [vmem:[#allocation2 + $0x100] sm:$0xff]  ;;  %v692_v14 = vld [vmem:[#allocation2 + $0x108] sm:$0xff]  ;;  %v693_v23 = vld [vmem:[#allocation2 + $0x110] sm:$0xff] }
  0x38   :  { %2831 = vmatpush3.bf16.msra.mxu0 %v2830_v41  ;;  %v707_v17 = vld [vmem:[#allocation2 + $0x180] sm:$0xff]  ;;  %v708_v18 = vld [vmem:[#allocation2 + $0x188] sm:$0xff]  ;;  %v709_v29 = vld [vmem:[#allocation2 + $0x190] sm:$0xff] }
  0x39   :  { %2810 = vmatpush3.bf16.msra.mxu1 %v2809_v21  ;;  %2832 = vmatprep.subr.bf16.mxu0 %v3255_v20  ;;  %v2854_v21 = vpack.c.bf16 %v692_v14, %v691_v13  ;;  %v696_v34 = vld [vmem:[#allocation2 + $0x128] sm:$0xff]  ;;  %v711_v36 = vld [vmem:[#allocation2 + $0x1a0] sm:$0xff]  ;;  %v697_v39 = vld [vmem:[#allocation2 + $0x130] sm:$0xff] }
  0x3a   :  { %2811 = vmatprep.subr.bf16.mxu1 %v3255_v20  ;;  %v698_v40 = vld [vmem:[#allocation2 + $0x138] sm:$0xff]  ;;  %v700_v46 = vld [vmem:[#allocation2 + $0x148] sm:$0xff]  ;;  %v715_v49 = vld [vmem:[#allocation2 + $0x1c0] sm:$0xff] }
  0x3b   :  { %v714_v43 = vld [vmem:[#allocation2 + $0x1b8] sm:$0xff]  ;;  %v2863_v44 = vpack.c.bf16 %v698_v40, %v697_v39  ;;  %v716_v50 = vld [vmem:[#allocation2 + $0x1c8] sm:$0xff]  ;;  %v701_v52 = vld [vmem:[#allocation2 + $0x150] sm:$0xff] }
  0x3c   :  { %2834 = vmatpush3.bf16.msra.mxu0 %v2833_v45  ;;  %v699_v45 = vld [vmem:[#allocation2 + $0x140] sm:$0xff]  ;;  %v702_v53 = vld [vmem:[#allocation2 + $0x158] sm:$0xff]  ;;  %v2890_v56 = vpack.c.bf16 %v716_v50, %v715_v49  ;;  %v704_v62 = vld [vmem:[#allocation2 + $0x168] sm:$0xff] }
  0x3d   :  { %2813 = vmatpush3.bf16.msra.mxu1 %v2812_v24  ;;  %2835 = vmatprep.subr.bf16.mxu0 %v3255_v20  ;;  %v694_v24 = vld [vmem:[#allocation2 + $0x118] sm:$0xff]  ;;  %v2869_v59 = vpack.c.bf16 %v702_v53, %v701_v52  ;;  %v703_v61 = vld [vmem:[#allocation2 + $0x160] sm:$0xff]  ;;  %v740_v14 = vld [vmem:[#allocation2 + $0x288] sm:$0xff] }
  0x3e   :  { %2814 = vmatprep.subr.bf16.mxu1 %v3255_v20  ;;  %v2857_v32 = vpack.c.bf16 %v694_v24, %v693_v23  ;;  %v718_v58 = vld [vmem:[#allocation2 + $0x1d8] sm:$0xff]  ;;  %v739_v13 = vld [vmem:[#allocation2 + $0x280] sm:$0xff]  ;;  %v741_v24 = vld [vmem:[#allocation2 + $0x290] sm:$0xff] }
  0x3f   :  { %v2926_v23 = vpack.c.bf16 %v740_v14, %v739_v13  ;;  %v731_v40 = vld [vmem:[#allocation2 + $0x240] sm:$0xff]  ;;  %v749_v52 = vld [vmem:[#allocation2 + $0x2d0] sm:$0xff]  ;;  %v750_v53 = vld [vmem:[#allocation2 + $0x2d8] sm:$0xff] }
  0x40   :  { %2837 = vmatpush3.bf16.msra.mxu0 %v2836_v48  ;;  %v1995_v48 = vld [vmem:[%s3639_s2 + $0x2] ss:$0 sm:$0xff]  ;;  %v1998_v49 = vld [vmem:[%s3639_s2 + $0x5] ss:$0 sm:$0xff]  ;;  %v1319_v14 = vld [vmem:[#allocation5 + $0x10] sm:$0xff] }
  0x41   :  { %2816 = vmatpush3.bf16.msra.mxu1 %v2815_v27  ;;  %2838 = vmatprep.subr.bf16.mxu0 %v3255_v20  ;;  %v2878_v27 = vpack.c.bf16 %v708_v18, %v707_v17  ;;  %v725_v18 = vld [vmem:[#allocation2 + $0x210] sm:$0xff] }
  0x42   :  { %2817 = vmatprep.subr.bf16.mxu1 %v3255_v20 }
  0x44   :  { %2840 = vmatpush3.bf16.msra.mxu0 %v2839_v51  ;;  %v2866_v51 = vpack.c.bf16 %v700_v46, %v699_v45  ;;  %v748_v45 = vld [vmem:[#allocation2 + $0x2c8] sm:$0xff] }
  0x45   :  { %2819 = vmatpush3.bf16.msra.mxu1 %v2818_v30  ;;  %2841 = vmatprep.subr.bf16.mxu0 %v3255_v20  ;;  %v710_v30 = vld [vmem:[#allocation2 + $0x198] sm:$0xff] }
  0x46   :  { %2820 = vmatprep.subr.bf16.mxu1 %v3255_v20  ;;  %v2881_v35 = vpack.c.bf16 %v710_v30, %v709_v29  ;;  %v728_v29 = vld [vmem:[#allocation2 + $0x228] sm:$0xff] }
  0x48   :  { %2843 = vmatpush3.bf16.msra.mxu0 %v2842_v54  ;;  %v1996_v54 = vld [vmem:[%s3639_s2 + $0x3] ss:$0 sm:$0xff] }
  0x49   :  { %2822 = vmatpush3.bf16.msra.mxu1 %v2821_v33  ;;  %2844 = vmatprep.subr.bf16.mxu0 %v3255_v20  ;;  %v695_v33 = vld [vmem:[#allocation2 + $0x120] sm:$0xff] }
  0x4a   :  { %2823 = vmatprep.subr.bf16.mxu1 %v3255_v20  ;;  %v2860_v38 = vpack.c.bf16 %v696_v34, %v695_v33  ;;  %v729_v34 = vld [vmem:[#allocation2 + $0x230] sm:$0xff] }
  0x4c   :  { %2846 = vmatpush3.bf16.msra.mxu0 %v2845_v57  ;;  %v717_v57 = vld [vmem:[#allocation2 + $0x1d0] sm:$0xff] }
  0x4d   :  { %2825 = vmatpush3.bf16.msra.mxu1 %v2824_v37  ;;  %2847 = vmatprep.subr.bf16.mxu0 %v3255_v20  ;;  %v712_v37 = vld [vmem:[#allocation2 + $0x1a8] sm:$0xff] }
  0x4e   :  { %2826 = vmatprep.subr.bf16.mxu1 %v3255_v20  ;;  %v2884_v41 = vpack.c.bf16 %v712_v37, %v711_v36  ;;  %v745_v37 = vld [vmem:[#allocation2 + $0x2b0] sm:$0xff] }
  0x50   :  { %2849 = vmatpush3.bf16.msra.mxu0 %v2848_v60 }
  0x51   :  { %2828 = vmatpush3.bf16.msra.mxu1 %v2827_v42  ;;  %2850 = vmatprep.subr.bf16.mxu0 %v3255_v20  ;;  %v713_v42 = vld [vmem:[#allocation2 + $0x1b0] sm:$0xff] }
  0x52   :  { %2853 = vmatprep.subr.bf16.mxu1 %v3255_v20  ;;  %v2887_v47 = vpack.c.bf16 %v714_v43, %v713_v42  ;;  %v1997_v43 = vld [vmem:[%s3639_s2 + $0x4] ss:$0 sm:$0xff] }
  0x54   :  { %2852 = vmatpush3.bf16.msra.mxu0 %v2851_v63  ;;  %v2893_v63 = vpack.c.bf16 %v718_v58, %v717_v57  ;;  %v736_v57 = vld [vmem:[#allocation2 + $0x268] sm:$0xff]  ;;  %v2941_v58 = vpack.c.bf16 %v750_v53, %v749_v52  ;;  %v1329_v52 = vld [vmem:[#allocation5 + $0x60] sm:$0xff] }
  0x55   :  { %2877 = vmatprep.subr.bf16.mxu0 %v3255_v20  ;;  %v1330_v53 = vld [vmem:[#allocation5 + $0x68] sm:$0xff] }
  0xfd   :  { %v192_v2 = vpop.f32.mrb[0].mxu0 }
  0xfe   :  { %v193_v4 = vadd.f32 %v1993_v1, %v192_v2  ;;  %v2284_v5 = vpop.f32.mrb[1].mxu0  ;;  %v719_v1 = vld [vmem:[#allocation2 + $0x1e0] sm:$0xff]  ;;  %v720_v2 = vld [vmem:[#allocation2 + $0x1e8] sm:$0xff] }
  0xff   :  { %v268_v6 = vpop.f32.mrb[0].mxu1  ;;  %v706_v5 = vld [vmem:[#allocation2 + $0x178] sm:$0xff] }
 0x100   :  { %3149 = vtanh.f32 %v193_v4  ;;  %v269_v7 = vadd.f32 %v1994_v3, %v268_v6  ;;  %v2289_v8 = vpop.f32.mrb[1].mxu1  ;;  %v2872_v3 = vpack.c.bf16 %v704_v62, %v703_v61  ;;  %v705_v4 = vld [vmem:[#allocation2 + $0x170] sm:$0xff]  ;;  %v2896_v6 = vpack.c.bf16 %v720_v2, %v719_v1  ;;  %v738_v62 = vld [vmem:[#allocation2 + $0x278] sm:$0xff] }
 0x101   :  { %v3432_v9 = vpop.f32.mrb[2].mxu0  ;;  %v722_v8 = vld [vmem:[#allocation2 + $0x1f8] sm:$0xff]  ;;  %v737_v61 = vld [vmem:[#allocation2 + $0x270] sm:$0xff] }
 0x102   :  { %3151 = vtanh.f32 %v269_v7  ;;  %v2294_v10 = vpop.f32.mrb[3].mxu0  ;;  %v345_v55 = vadd.f32 %v1995_v48, %v3432_v9  ;;  %v721_v7 = vld [vmem:[#allocation2 + $0x1f0] sm:$0xff]  ;;  %v2875_v9 = vpack.c.bf16 %v706_v5, %v705_v4  ;;  %v734_v48 = vld [vmem:[#allocation2 + $0x258] sm:$0xff]  ;;  %v2923_v2 = vpack.c.bf16 %v738_v62, %v737_v61  ;;  %v756_v4 = vld [vmem:[#allocation2 + $0x308] sm:$0xff] }
 0x103   :  { %v3434_v11 = vpop.f32.mrb[2].mxu1  ;;  %v723_v10 = vld [vmem:[#allocation2 + $0x200] sm:$0xff]  ;;  %v754_v1 = vld [vmem:[#allocation2 + $0x2f8] sm:$0xff]  ;;  %v1335_v62 = vld [vmem:[#allocation5 + $0x90] sm:$0xff] }
 0x104   :  { %v2299_v12 = vpop.f32.mrb[3].mxu1  ;;  %v421_v60 = vadd.f32 %v1996_v54, %v3434_v11  ;;  %3153 = vtanh.f32 %v345_v55  ;;  %v724_v11 = vld [vmem:[#allocation2 + $0x208] sm:$0xff] }
 0x105   :  { %v3436_v15 = vpop.f32.mrb[4].mxu0  ;;  %v2899_v12 = vpack.c.bf16 %v722_v8, %v721_v7  ;;  %v2902_v17 = vpack.c.bf16 %v724_v11, %v723_v10  ;;  %v1318_v7 = vld [vmem:[#allocation5 + $0x8] sm:$0xff]  ;;  %v757_v10 = vld [vmem:[#allocation2 + $0x310] sm:$0xff]  ;;  %v758_v11 = vld [vmem:[#allocation2 + $0x318] sm:$0xff] }
 0x106   :  { %v2304_v16 = vpop.f32.mrb[5].mxu0  ;;  %3155 = vtanh.f32 %v421_v60  ;;  %v497_v50 = vadd.f32 %v1997_v43, %v3436_v15  ;;  %v751_v15 = vld [vmem:[#allocation2 + $0x2e0] sm:$0xff] }
 0x107   :  { %v3438_v19 = vpop.f32.mrb[4].mxu1 }
 0x108   :  { %v2309_v22 = vpop.f32.mrb[5].mxu1  ;;  %v573_v55 = vadd.f32 %v1998_v49, %v3438_v19  ;;  %3157 = vtanh.f32 %v497_v50 }
 0x109   :  { %v3440_v25 = vpop.f32.mrb[6].mxu0 }
 0x10a   :  { %v3150_v26 = vpop.eup %3149  ;;  %v2314_v28 = vpop.f32.mrb[7].mxu0  ;;  %3159 = vtanh.f32 %v573_v55  ;;  %v1331_v55 = vld [vmem:[#allocation5 + $0x70] sm:$0xff] }
 0x10b   :  { %2348 = vmatmul.mubr.f32.vlgmr.msra.gmra.mrb[6].mxu1 %v3150_v26  ;;  %v742_v26 = vld [vmem:[#allocation2 + $0x298] sm:$0xff]  ;;  %v727_v28 = vld [vmem:[#allocation2 + $0x220] sm:$0xff] }
 0x10c   :  { %v3152_v31 = vpop.eup %3151  ;;  %2855 = vmatpush3.bf16.msra.mxu1 %v2854_v21  ;;  %2417 = vmatprep.mubr.msk.f32.mxu1 %vm3254_vm0, %v3253_v0  ;;  %v726_v21 = vld [vmem:[#allocation2 + $0x218] sm:$0xff]  ;;  %v2929_v30 = vpack.c.bf16 %v742_v26, %v741_v24  ;;  %v2908_v33 = vpack.c.bf16 %v728_v29, %v727_v28  ;;  %v1322_v24 = vld [vmem:[#allocation5 + $0x28] sm:$0xff] }
 0x10d   :  { %2856 = vmatprep.subr.bf16.mxu1 %v3255_v20  ;;  %2383 = vmatmul.mubr.f32.vlgmr.msra.gmra.mrb[8].mxu0 %v3152_v31  ;;  %v743_v31 = vld [vmem:[#allocation2 + $0x2a0] sm:$0xff]  ;;  %v762_v28 = vld [vmem:[#allocation2 + $0x338] sm:$0xff] }
 0x10e   :  { %2879 = vmatpush3.bf16.msra.mxu0 %v2878_v27  ;;  %2452 = vmatprep.mubr.msk.f32.mxu0 %vm3254_vm0, %v3253_v0  ;;  %v3154_v16 = vpop.eup %3153  ;;  %v2905_v27 = vpack.c.bf16 %v726_v21, %v725_v18  ;;  %v759_v18 = vld [vmem:[#allocation2 + $0x320] sm:$0xff]  ;;  %v760_v21 = vld [vmem:[#allocation2 + $0x328] sm:$0xff] }
 0x10f   :  { %2880 = vmatprep.subr.bf16.mxu0 %v3255_v20  ;;  %v2956_v26 = vpack.c.bf16 %v760_v21, %v759_v18  ;;  %v1348_v18 = vld [vmem:[#allocation5 + $0xf8] sm:$0xff] }
 0x110   :  { %2858 = vmatpush3.bf16.msra.mxu1 %v2857_v32  ;;  %v3156_v22 = vpop.eup %3155  ;;  %v744_v32 = vld [vmem:[#allocation2 + $0x2a8] sm:$0xff] }
 0x111   :  { %2859 = vmatprep.subr.bf16.mxu1 %v3255_v20  ;;  %v2932_v36 = vpack.c.bf16 %v744_v32, %v743_v31  ;;  %v1324_v31 = vld [vmem:[#allocation5 + $0x38] sm:$0xff] }
 0x112   :  { %2882 = vmatpush3.bf16.msra.mxu0 %v2881_v35  ;;  %v730_v35 = vld [vmem:[#allocation2 + $0x238] sm:$0xff]  ;;  %v3158_v8 = vpop.eup %3157 }
 0x113   :  { %2883 = vmatprep.subr.bf16.mxu0 %v3255_v20  ;;  %v2911_v39 = vpack.c.bf16 %v730_v35, %v729_v34  ;;  %v764_v34 = vld [vmem:[#allocation2 + $0x348] sm:$0xff] }
 0x114   :  { %2861 = vmatpush3.bf16.msra.mxu1 %v2860_v38  ;;  %v746_v38 = vld [vmem:[#allocation2 + $0x2b8] sm:$0xff] }
 0x115   :  { %2862 = vmatprep.subr.bf16.mxu1 %v3255_v20  ;;  %v2935_v42 = vpack.c.bf16 %v746_v38, %v745_v37  ;;  %v1325_v37 = vld [vmem:[#allocation5 + $0x40] sm:$0xff]  ;;  %v1326_v38 = vld [vmem:[#allocation5 + $0x48] sm:$0xff] }
 0x116   :  { %2885 = vmatpush3.bf16.msra.mxu0 %v2884_v41  ;;  %v732_v41 = vld [vmem:[#allocation2 + $0x248] sm:$0xff]  ;;  %v2986_v43 = vpack.c.bf16 %v1326_v38, %v1325_v37  ;;  %v1352_v37 = vld [vmem:[#allocation5 + $0x118] sm:$0xff] }
 0x117   :  { %2886 = vmatprep.subr.bf16.mxu0 %v3255_v20  ;;  %v2914_v46 = vpack.c.bf16 %v732_v41, %v731_v40  ;;  %v765_v40 = vld [vmem:[#allocation2 + $0x350] sm:$0xff]  ;;  %v766_v41 = vld [vmem:[#allocation2 + $0x358] sm:$0xff] }
 0x118   :  { %2864 = vmatpush3.bf16.msra.mxu1 %v2863_v44  ;;  %v747_v44 = vld [vmem:[#allocation2 + $0x2c0] sm:$0xff] }
 0x119   :  { %2865 = vmatprep.subr.bf16.mxu1 %v3255_v20 }
 0x11a   :  { %2888 = vmatpush3.bf16.msra.mxu0 %v2887_v47  ;;  %v733_v47 = vld [vmem:[#allocation2 + $0x250] sm:$0xff] }
 0x11b   :  { %2889 = vmatprep.subr.bf16.mxu0 %v3255_v20  ;;  %v2917_v54 = vpack.c.bf16 %v734_v48, %v733_v47  ;;  %v1327_v47 = vld [vmem:[#allocation5 + $0x50] sm:$0xff]  ;;  %v1328_v48 = vld [vmem:[#allocation5 + $0x58] sm:$0xff] }
 0x11c   :  { %2867 = vmatpush3.bf16.msra.mxu1 %v2866_v51  ;;  %v2938_v51 = vpack.c.bf16 %v748_v45, %v747_v44  ;;  %v2965_v44 = vpack.c.bf16 %v766_v41, %v765_v40  ;;  %v767_v45 = vld [vmem:[#allocation2 + $0x360] sm:$0xff]  ;;  %v2989_v49 = vpack.c.bf16 %v1328_v48, %v1327_v47  ;;  %v1367_v40 = vld [vmem:[#allocation5 + $0x190] sm:$0xff]  ;;  %v1368_v41 = vld [vmem:[#allocation5 + $0x198] sm:$0xff] }
 0x11d   :  { %2868 = vmatprep.subr.bf16.mxu1 %v3255_v20  ;;  %v1369_v47 = vld [vmem:[#allocation5 + $0x1a0] sm:$0xff]  ;;  %v1370_v48 = vld [vmem:[#allocation5 + $0x1a8] sm:$0xff] }
 0x11e   :  { %2891 = vmatpush3.bf16.msra.mxu0 %v2890_v56  ;;  %v735_v56 = vld [vmem:[#allocation2 + $0x260] sm:$0xff] }
 0x11f   :  { %2892 = vmatprep.subr.bf16.mxu0 %v3255_v20  ;;  %v2920_v60 = vpack.c.bf16 %v736_v57, %v735_v56  ;;  %v1332_v56 = vld [vmem:[#allocation5 + $0x78] sm:$0xff] }
 0x120   :  { %2870 = vmatpush3.bf16.msra.mxu1 %v2869_v59  ;;  %v752_v59 = vld [vmem:[#allocation2 + $0x2e8] sm:$0xff] }
 0x121   :  { %2871 = vmatprep.subr.bf16.mxu1 %v3255_v20  ;;  %v2944_v19 = vpack.c.bf16 %v752_v59, %v751_v15  ;;  %v1334_v15 = vld [vmem:[#allocation5 + $0x88] sm:$0xff]  ;;  %v2995_v59 = vpack.c.bf16 %v1332_v56, %v1331_v55  ;;  %v1357_v55 = vld [vmem:[#allocation5 + $0x140] sm:$0xff] }
 0x122   :  { %2894 = vmatpush3.bf16.msra.mxu0 %v2893_v63  ;;  %v753_v63 = vld [vmem:[#allocation2 + $0x2f0] sm:$0xff]  ;;  %v1358_v56 = vld [vmem:[#allocation5 + $0x148] sm:$0xff] }
 0x123   :  { %2895 = vmatprep.subr.bf16.mxu0 %v3255_v20  ;;  %v2947_v5 = vpack.c.bf16 %v754_v1, %v753_v63  ;;  %v1337_v1 = vld [vmem:[#allocation5 + $0xa0] sm:$0xff] }
 0x124   :  { %2873 = vmatpush3.bf16.msra.mxu1 %v2872_v3  ;;  %v755_v3 = vld [vmem:[#allocation2 + $0x300] sm:$0xff] }
 0x125   :  { %2874 = vmatprep.subr.bf16.mxu1 %v3255_v20 }
 0x126   :  { %2897 = vmatpush3.bf16.msra.mxu0 %v2896_v6  ;;  %v1317_v6 = vld [vmem:[#allocation5] sm:$0xff] }
 0x127   :  { %2898 = vmatprep.subr.bf16.mxu0 %v3255_v20  ;;  %v2974_v13 = vpack.c.bf16 %v1318_v7, %v1317_v6  ;;  %v1341_v7 = vld [vmem:[#allocation5 + $0xc0] sm:$0xff] }
 0x128   :  { %2876 = vmatpush3.bf16.msra.mxu1 %v2875_v9  ;;  %v2950_v9 = vpack.c.bf16 %v756_v4, %v755_v3  ;;  %v1339_v4 = vld [vmem:[#allocation5 + $0xb0] sm:$0xff] }
 0x129   :  { %2901 = vmatprep.subr.bf16.mxu1 %v3255_v20 }
 0x12a   :  { %2900 = vmatpush3.bf16.msra.mxu0 %v2899_v12  ;;  %v3160_v12 = vpop.eup %3159 }
 0x12b   :  { %2418 = vmatmul.mubr.f32.vlgmr.msra.gmra.mrb[8].mxu1 %v3154_v16  ;;  %2925 = vmatprep.subr.bf16.mxu0 %v3255_v20  ;;  %v1320_v16 = vld [vmem:[#allocation5 + $0x18] sm:$0xff] }
 0x12c   :  { %2903 = vmatpush3.bf16.msra.mxu1 %v2902_v17  ;;  %2487 = vmatprep.mubr.msk.f32.mxu1 %vm3254_vm0, %v3253_v0  ;;  %v2953_v17 = vpack.c.bf16 %v758_v11, %v757_v10  ;;  %v1343_v10 = vld [vmem:[#allocation5 + $0xd0] sm:$0xff]  ;;  %v1344_v11 = vld [vmem:[#allocation5 + $0xd8] sm:$0xff] }
 0x12d   :  { %2904 = vmatprep.subr.bf16.mxu1 %v3255_v20  ;;  %2453 = vmatmul.mubr.f32.vlgmr.msra.gmra.mrb[10].mxu0 %v3156_v22  ;;  %v2977_v22 = vpack.c.bf16 %v1320_v16, %v1319_v14  ;;  %v1346_v14 = vld [vmem:[#allocation5 + $0xe8] sm:$0xff] }
 0x12e   :  { %2927 = vmatpush3.bf16.msra.mxu0 %v2926_v23  ;;  %2522 = vmatprep.mubr.msk.f32.mxu0 %vm3254_vm0, %v3253_v0  ;;  %v1321_v23 = vld [vmem:[#allocation5 + $0x20] sm:$0xff] }
 0x12f   :  { %2928 = vmatprep.subr.bf16.mxu0 %v3255_v20  ;;  %v2980_v29 = vpack.c.bf16 %v1322_v24, %v1321_v23  ;;  %v2015_v24 = vld [vmem:[%s3641_s4 + $0x1] ss:$0 sm:$0xff] }
 0x130   :  { %2906 = vmatpush3.bf16.msra.mxu1 %v2905_v27  ;;  %v761_v27 = vld [vmem:[#allocation2 + $0x330] sm:$0xff] }
 0x131   :  { %2907 = vmatprep.subr.bf16.mxu1 %v3255_v20  ;;  %v2959_v32 = vpack.c.bf16 %v762_v28, %v761_v27 }
 0x132   :  { %2930 = vmatpush3.bf16.msra.mxu0 %v2929_v30  ;;  %v1323_v30 = vld [vmem:[#allocation5 + $0x30] sm:$0xff] }
 0x133   :  { %2931 = vmatprep.subr.bf16.mxu0 %v3255_v20  ;;  %v2983_v35 = vpack.c.bf16 %v1324_v31, %v1323_v30  ;;  %v1349_v31 = vld [vmem:[#allocation5 + $0x100] sm:$0xff] }
 0x134   :  { %2909 = vmatpush3.bf16.msra.mxu1 %v2908_v33  ;;  %v763_v33 = vld [vmem:[#allocation2 + $0x340] sm:$0xff] }
 0x135   :  { %2910 = vmatprep.subr.bf16.mxu1 %v3255_v20 }
 0x136   :  { %2933 = vmatpush3.bf16.msra.mxu0 %v2932_v36  ;;  %v1999_v36 = vld [vmem:[%s3639_s2 + $0x6] ss:$0 sm:$0xff] }
 0x137   :  { %2934 = vmatprep.subr.bf16.mxu0 %v3255_v20 }
 0x138   :  { %2912 = vmatpush3.bf16.msra.mxu1 %v2911_v39  ;;  %v2962_v39 = vpack.c.bf16 %v764_v34, %v763_v33  ;;  %v1365_v33 = vld [vmem:[#allocation5 + $0x180] sm:$0xff]  ;;  %v1366_v34 = vld [vmem:[#allocation5 + $0x188] sm:$0xff] }
 0x139   :  { %2913 = vmatprep.subr.bf16.mxu1 %v3255_v20 }
 0x13a   :  { %2936 = vmatpush3.bf16.msra.mxu0 %v2935_v42  ;;  %v649_v42 = vadd.f32 %v1999_v36, %v3440_v25  ;;  %v769_v25 = vld [vmem:[#allocation2 + $0x370] sm:$0xff] }
 0x13b   :  { %2937 = vmatprep.subr.bf16.mxu0 %v3255_v20  ;;  %v1351_v36 = vld [vmem:[#allocation5 + $0x110] sm:$0xff] }
 0x13c   :  { %2915 = vmatpush3.bf16.msra.mxu1 %v2914_v46  ;;  %v768_v46 = vld [vmem:[#allocation2 + $0x368] sm:$0xff]  ;;  %3161 = vtanh.f32 %v649_v42 }
 0x13d   :  { %2916 = vmatprep.subr.bf16.mxu1 %v3255_v20  ;;  %v2968_v50 = vpack.c.bf16 %v768_v46, %v767_v45  ;;  %v1354_v45 = vld [vmem:[#allocation5 + $0x128] sm:$0xff]  ;;  %v3049_v46 = vpack.c.bf16 %v1368_v41, %v1367_v40  ;;  %v1385_v40 = vld [vmem:[#allocation5 + $0x220] sm:$0xff] }
 0x13e   :  { %2939 = vmatpush3.bf16.msra.mxu0 %v2938_v51  ;;  %v770_v51 = vld [vmem:[#allocation2 + $0x378] sm:$0xff]  ;;  %v1386_v41 = vld [vmem:[#allocation5 + $0x228] sm:$0xff] }
 0x13f   :  { %2940 = vmatprep.subr.bf16.mxu0 %v3255_v20  ;;  %v2971_v57 = vpack.c.bf16 %v770_v51, %v769_v25  ;;  %v1356_v25 = vld [vmem:[#allocation5 + $0x138] sm:$0xff]  ;;  %v3052_v51 = vpack.c.bf16 %v1370_v48, %v1369_v47 }
 0x140   :  { %2918 = vmatpush3.bf16.msra.mxu1 %v2917_v54  ;;  %v2992_v54 = vpack.c.bf16 %v1330_v53, %v1329_v52  ;;  %v1371_v52 = vld [vmem:[#allocation5 + $0x1b0] sm:$0xff]  ;;  %v1372_v53 = vld [vmem:[#allocation5 + $0x1b8] sm:$0xff] }
 0x141   :  { %2919 = vmatprep.subr.bf16.mxu1 %v3255_v20  ;;  %v1388_v47 = vld [vmem:[#allocation5 + $0x238] sm:$0xff] }
 0x142   :  { %2942 = vmatpush3.bf16.msra.mxu0 %v2941_v58  ;;  %v1333_v58 = vld [vmem:[#allocation5 + $0x80] sm:$0xff] }
 0x143   :  { %2943 = vmatprep.subr.bf16.mxu0 %v3255_v20  ;;  %v2998_v61 = vpack.c.bf16 %v1334_v15, %v1333_v58  ;;  %v1373_v58 = vld [vmem:[#allocation5 + $0x1c0] sm:$0xff]  ;;  %v1374_v15 = vld [vmem:[#allocation5 + $0x1c8] sm:$0xff] }
 0x144   :  { %2921 = vmatpush3.bf16.msra.mxu1 %v2920_v60 }
 0x145   :  { %2922 = vmatprep.subr.bf16.mxu1 %v3255_v20 }
 0x146   :  { %2945 = vmatpush3.bf16.msra.mxu0 %v2944_v19  ;;  %v3162_v60 = vpop.eup %3161  ;;  %v1336_v19 = vld [vmem:[#allocation5 + $0x98] sm:$0xff] }
 0x147   :  { %2946 = vmatprep.subr.bf16.mxu0 %v3255_v20  ;;  %v3001_v63 = vpack.c.bf16 %v1336_v19, %v1335_v62  ;;  %v3058_v62 = vpack.c.bf16 %v1374_v15, %v1373_v58  ;;  %v2016_v19 = vld [vmem:[%s3641_s4 + $0x2] ss:$0 sm:$0xff]  ;;  %v1392_v58 = vld [vmem:[#allocation5 + $0x258] sm:$0xff] }
 0x148   :  { %2924 = vmatpush3.bf16.msra.mxu1 %v2923_v2  ;;  %v1338_v2 = vld [vmem:[#allocation5 + $0xa8] sm:$0xff] }
 0x149   :  { %2949 = vmatprep.subr.bf16.mxu1 %v3255_v20  ;;  %v3004_v3 = vpack.c.bf16 %v1338_v2, %v1337_v1  ;;  %v1376_v1 = vld [vmem:[#allocation5 + $0x1d8] sm:$0xff] }
 0x14a   :  { %2948 = vmatpush3.bf16.msra.mxu0 %v2947_v5  ;;  %v1340_v5 = vld [vmem:[#allocation5 + $0xb8] sm:$0xff] }
 0x14b   :  { %2488 = vmatmul.mubr.f32.vlgmr.msra.gmra.mrb[10].mxu1 %v3158_v8  ;;  %2973 = vmatprep.subr.bf16.mxu0 %v3255_v20  ;;  %v3007_v6 = vpack.c.bf16 %v1340_v5, %v1339_v4  ;;  %v1342_v8 = vld [vmem:[#allocation5 + $0xc8] sm:$0xff]  ;;  %v1361_v4 = vld [vmem:[#allocation5 + $0x160] sm:$0xff] }
 0x14c   :  { %2951 = vmatpush3.bf16.msra.mxu1 %v2950_v9  ;;  %2557 = vmatprep.mubr.msk.f32.mxu1 %vm3254_vm0, %v3253_v0  ;;  %v3010_v9 = vpack.c.bf16 %v1342_v8, %v1341_v7  ;;  %v1362_v5 = vld [vmem:[#allocation5 + $0x168] sm:$0xff] }
 0x14d   :  { %2952 = vmatprep.subr.bf16.mxu1 %v3255_v20  ;;  %2523 = vmatmul.mubr.f32.vlgmr.msra.gmra.mrb[12].mxu0 %v3160_v12  ;;  %v3013_v12 = vpack.c.bf16 %v1344_v11, %v1343_v10  ;;  %v1377_v11 = vld [vmem:[#allocation5 + $0x1e0] sm:$0xff] }
 0x14e   :  { %2975 = vmatpush3.bf16.msra.mxu0 %v2974_v13  ;;  %2592 = vmatprep.mubr.msk.f32.mxu0 %vm3254_vm0, %v3253_v0  ;;  %v1345_v13 = vld [vmem:[#allocation5 + $0xe0] sm:$0xff] }
 0x14f   :  { %2976 = vmatprep.subr.bf16.mxu0 %v3255_v20  ;;  %v3016_v16 = vpack.c.bf16 %v1346_v14, %v1345_v13  ;;  %v3040_v13 = vpack.c.bf16 %v1362_v5, %v1361_v4 }
 0x150   :  { %2954 = vmatpush3.bf16.msra.mxu1 %v2953_v17  ;;  %v1347_v17 = vld [vmem:[#allocation5 + $0xf0] sm:$0xff] }
 0x151   :  { %2955 = vmatprep.subr.bf16.mxu1 %v3255_v20  ;;  %v3019_v21 = vpack.c.bf16 %v1348_v18, %v1347_v17  ;;  %v1363_v17 = vld [vmem:[#allocation5 + $0x170] sm:$0xff]  ;;  %v1364_v18 = vld [vmem:[#allocation5 + $0x178] sm:$0xff] }
 0x152   :  { %2978 = vmatpush3.bf16.msra.mxu0 %v2977_v22  ;;  %v2014_v22 = vld [vmem:[%s3641_s4] ss:$0 sm:$0xff] }
 0x153   :  { %2979 = vmatprep.subr.bf16.mxu0 %v3255_v20 }
 0x154   :  { %2957 = vmatpush3.bf16.msra.mxu1 %v2956_v26 }
 0x155   :  { %2958 = vmatprep.subr.bf16.mxu1 %v3255_v20 }
 0x156   :  { %2981 = vmatpush3.bf16.msra.mxu0 %v2980_v29 }
 0x157   :  { %2982 = vmatprep.subr.bf16.mxu0 %v3255_v20 }
 0x158   :  { %2960 = vmatpush3.bf16.msra.mxu1 %v2959_v32  ;;  %v1350_v32 = vld [vmem:[#allocation5 + $0x108] sm:$0xff] }
 0x159   :  { %2961 = vmatprep.subr.bf16.mxu1 %v3255_v20 }
 0x15a   :  { %2984 = vmatpush3.bf16.msra.mxu0 %v2983_v35  ;;  %v3022_v35 = vpack.c.bf16 %v1350_v32, %v1349_v31  ;;  %v1383_v32 = vld [vmem:[#allocation5 + $0x210] sm:$0xff] }
 0x15b   :  { %2985 = vmatprep.subr.bf16.mxu0 %v3255_v20 }
 0x15c   :  { %2963 = vmatpush3.bf16.msra.mxu1 %v2962_v39  ;;  %v3046_v39 = vpack.c.bf16 %v1366_v34, %v1365_v33  ;;  %v1384_v33 = vld [vmem:[#allocation5 + $0x218] sm:$0xff] }
 0x15d   :  { %2964 = vmatprep.subr.bf16.mxu1 %v3255_v20 }
 0x15e   :  { %2987 = vmatpush3.bf16.msra.mxu0 %v2986_v43  ;;  %v3025_v43 = vpack.c.bf16 %v1352_v37, %v1351_v36  ;;  %v1399_v36 = vld [vmem:[#allocation5 + $0x290] sm:$0xff]  ;;  %v1400_v37 = vld [vmem:[#allocation5 + $0x298] sm:$0xff] }
 0x15f   :  { %2988 = vmatprep.subr.bf16.mxu0 %v3255_v20 }
 0x160   :  { %2966 = vmatpush3.bf16.msra.mxu1 %v2965_v44  ;;  %v1353_v44 = vld [vmem:[#allocation5 + $0x120] sm:$0xff] }
 0x161   :  { %2967 = vmatprep.subr.bf16.mxu1 %v3255_v20 }
 0x162   :  { %2990 = vmatpush3.bf16.msra.mxu0 %v2989_v49  ;;  %v3028_v49 = vpack.c.bf16 %v1354_v45, %v1353_v44  ;;  %v1402_v44 = vld [vmem:[#allocation5 + $0x2a8] sm:$0xff]  ;;  %v3076_v45 = vpack.c.bf16 %v1386_v41, %v1385_v40  ;;  %v1424_v40 = vld [vmem:[#allocation5 + $0x358] sm:$0xff]  ;;  %v2020_v41 = vld [vmem:[%s3641_s4 + $0x6] ss:$0 sm:$0xff] }
 0x163   :  { %2991 = vmatprep.subr.bf16.mxu0 %v3255_v20 }
 0x164   :  { %2969 = vmatpush3.bf16.msra.mxu1 %v2968_v50  ;;  %v1355_v50 = vld [vmem:[#allocation5 + $0x130] sm:$0xff] }
 0x165   :  { %2970 = vmatprep.subr.bf16.mxu1 %v3255_v20 }
 0x166   :  { %2993 = vmatpush3.bf16.msra.mxu0 %v2992_v54  ;;  %v3031_v54 = vpack.c.bf16 %v1356_v25, %v1355_v50  ;;  %v1404_v50 = vld [vmem:[#allocation5 + $0x2b8] sm:$0xff] }
 0x167   :  { %2994 = vmatprep.subr.bf16.mxu0 %v3255_v20 }
 0x168   :  { %2972 = vmatpush3.bf16.msra.mxu1 %v2971_v57  ;;  %v3055_v57 = vpack.c.bf16 %v1372_v53, %v1371_v52  ;;  %v1390_v52 = vld [vmem:[#allocation5 + $0x248] sm:$0xff] }
 0x169   :  { %2997 = vmatprep.subr.bf16.mxu1 %v3255_v20 }
 0x16a   :  { %2996 = vmatpush3.bf16.msra.mxu0 %v2995_v59  ;;  %v3034_v59 = vpack.c.bf16 %v1358_v56, %v1357_v55  ;;  %v1406_v55 = vld [vmem:[#allocation5 + $0x2c8] sm:$0xff] }
 0x16b   :  { %2558 = vmatmul.mubr.f32.vlgmr.msra.gmra.mrb[12].mxu1 %v3162_v60  ;;  %3021 = vmatprep.subr.bf16.mxu0 %v3255_v20  ;;  %v1359_v60 = vld [vmem:[#allocation5 + $0x150] sm:$0xff] }
 0x16c   :  { %2999 = vmatpush3.bf16.msra.mxu1 %v2998_v61  ;;  %2627 = vmatprep.mubr.msk.f32.mxu1 %vm3254_vm0, %v3253_v0  ;;  %v1360_v61 = vld [vmem:[#allocation5 + $0x158] sm:$0xff] }
 0x16d   :  { %3000 = vmatprep.subr.bf16.mxu1 %v3255_v20  ;;  %v3037_v2 = vpack.c.bf16 %v1360_v61, %v1359_v60  ;;  %v1407_v60 = vld [vmem:[#allocation5 + $0x2d0] sm:$0xff]  ;;  %v1408_v61 = vld [vmem:[#allocation5 + $0x2d8] sm:$0xff] }
 0x16e   :  { %v3109_v5 = vpack.c.bf16 %v1408_v61, %v1407_v60  ;;  %v2024_v60 = vld [vmem:[%s3643_s6 + $0x3] ss:$0 sm:$0xff] }
 0x170   :  { %3002 = vmatpush3.bf16.msra.mxu1 %v3001_v63  ;;  %v1375_v63 = vld [vmem:[#allocation5 + $0x1d0] sm:$0xff] }
 0x171   :  { %3003 = vmatprep.subr.bf16.mxu1 %v3255_v20 }
 0x174   :  { %3005 = vmatpush3.bf16.msra.mxu1 %v3004_v3 }
 0x175   :  { %3006 = vmatprep.subr.bf16.mxu1 %v3255_v20 }
 0x178   :  { %3008 = vmatpush3.bf16.msra.mxu1 %v3007_v6  ;;  %v2017_v6 = vld [vmem:[%s3641_s4 + $0x3] ss:$0 sm:$0xff] }
 0x179   :  { %3009 = vmatprep.subr.bf16.mxu1 %v3255_v20 }
 0x17c   :  { %3011 = vmatpush3.bf16.msra.mxu1 %v3010_v9  ;;  %v3061_v9 = vpack.c.bf16 %v1376_v1, %v1375_v63  ;;  %v1393_v63 = vld [vmem:[#allocation5 + $0x260] sm:$0xff]  ;;  %v1394_v1 = vld [vmem:[#allocation5 + $0x268] sm:$0xff] }
 0x17d   :  { %3012 = vmatprep.subr.bf16.mxu1 %v3255_v20 }
 0x180   :  { %3014 = vmatpush3.bf16.msra.mxu1 %v3013_v12  ;;  %v1378_v12 = vld [vmem:[#allocation5 + $0x1e8] sm:$0xff] }
 0x181   :  { %3015 = vmatprep.subr.bf16.mxu1 %v3255_v20 }
 0x184   :  { %3017 = vmatpush3.bf16.msra.mxu1 %v3016_v16 }
 0x185   :  { %3018 = vmatprep.subr.bf16.mxu1 %v3255_v20 }
 0x188   :  { %3020 = vmatpush3.bf16.msra.mxu1 %v3019_v21  ;;  %v3064_v21 = vpack.c.bf16 %v1378_v12, %v1377_v11  ;;  %v1395_v12 = vld [vmem:[#allocation5 + $0x270] sm:$0xff] }
 0x189   :  { %3045 = vmatprep.subr.bf16.mxu1 %v3255_v20 }
 0x1de   :  { %v886_v23 = vpop.f32.mrb[6].mxu1 }
 0x1df   :  { %v887_v26 = vadd.f32 %v2014_v22, %v886_v23  ;;  %v2349_v27 = vpop.f32.mrb[7].mxu1  ;;  %v1379_v22 = vld [vmem:[#allocation5 + $0x1f0] sm:$0xff]  ;;  %v1380_v23 = vld [vmem:[#allocation5 + $0x1f8] sm:$0xff] }
 0x1e0   :  { %v956_v28 = vpop.f32.mrb[8].mxu0  ;;  %v1382_v27 = vld [vmem:[#allocation5 + $0x208] sm:$0xff] }
 0x1e1   :  { %3163 = vtanh.f32 %v887_v26  ;;  %v957_v29 = vadd.f32 %v2015_v24, %v956_v28  ;;  %v2384_v30 = vpop.f32.mrb[9].mxu0  ;;  %v3043_v24 = vpack.c.bf16 %v1364_v18, %v1363_v17  ;;  %v1381_v26 = vld [vmem:[#allocation5 + $0x200] sm:$0xff]  ;;  %v3067_v28 = vpack.c.bf16 %v1380_v23, %v1379_v22  ;;  %v1412_v17 = vld [vmem:[#allocation5 + $0x2f8] sm:$0xff]  ;;  %v1414_v22 = vld [vmem:[#allocation5 + $0x308] sm:$0xff] }
 0x1e2   :  { %v1398_v30 = vld [vmem:[#allocation5 + $0x288] sm:$0xff]  ;;  %v3070_v31 = vpack.c.bf16 %v1382_v27, %v1381_v26  ;;  %v1415_v26 = vld [vmem:[#allocation5 + $0x310] sm:$0xff]  ;;  %v1416_v27 = vld [vmem:[#allocation5 + $0x318] sm:$0xff] }
 0x1e3   :  { %3165 = vtanh.f32 %v957_v29  ;;  %v1397_v29 = vld [vmem:[#allocation5 + $0x280] sm:$0xff] }
 0x1eb   :  { %v3164_v38 = vpop.eup %3163 }
 0x1ec   :  { %2593 = vmatmul.mubr.f32.vlgmr.msra.gmra.mrb[14].mxu0 %v3164_v38 }
 0x1ed   :  { %v3166_v42 = vpop.eup %3165  ;;  %3023 = vmatpush3.bf16.msra.mxu0 %v3022_v35  ;;  %2662 = vmatprep.mubr.msk.f32.mxu0 %vm3254_vm0, %v3253_v0  ;;  %v3094_v35 = vpack.c.bf16 %v1398_v30, %v1397_v29  ;;  %v3121_v30 = vpack.c.bf16 %v1416_v27, %v1415_v26 }
 0x1ee   :  { %3024 = vmatprep.subr.bf16.mxu0 %v3255_v20  ;;  %2628 = vmatmul.mubr.f32.vlgmr.msra.gmra.mrb[14].mxu1 %v3166_v42  ;;  %v3097_v42 = vpack.c.bf16 %v1400_v37, %v1399_v36  ;;  %v1421_v37 = vld [vmem:[#allocation5 + $0x340] sm:$0xff] }
 0x1ef   :  { %3047 = vmatpush3.bf16.msra.mxu1 %v3046_v39  ;;  %2697 = vmatprep.mubr.msk.f32.mxu1 %vm3254_vm0, %v3253_v0  ;;  %v3073_v39 = vpack.c.bf16 %v1384_v33, %v1383_v32  ;;  %v1418_v32 = vld [vmem:[#allocation5 + $0x328] sm:$0xff] }
 0x1f0   :  { %3048 = vmatprep.subr.bf16.mxu1 %v3255_v20 }
 0x1f1   :  { %3026 = vmatpush3.bf16.msra.mxu0 %v3025_v43  ;;  %v1401_v43 = vld [vmem:[#allocation5 + $0x2a0] sm:$0xff] }
 0x1f2   :  { %3027 = vmatprep.subr.bf16.mxu0 %v3255_v20  ;;  %v3100_v48 = vpack.c.bf16 %v1402_v44, %v1401_v43  ;;  %v1425_v44 = vld [vmem:[#allocation5 + $0x360] sm:$0xff] }
 0x1f3   :  { %3050 = vmatpush3.bf16.msra.mxu1 %v3049_v46  ;;  %v1387_v46 = vld [vmem:[#allocation5 + $0x230] sm:$0xff] }
 0x1f4   :  { %3051 = vmatprep.subr.bf16.mxu1 %v3255_v20  ;;  %v3079_v25 = vpack.c.bf16 %v1388_v47, %v1387_v46 }
 0x1f5   :  { %3029 = vmatpush3.bf16.msra.mxu0 %v3028_v49  ;;  %v1403_v49 = vld [vmem:[#allocation5 + $0x2b0] sm:$0xff] }
 0x1f6   :  { %3030 = vmatprep.subr.bf16.mxu0 %v3255_v20  ;;  %v3103_v53 = vpack.c.bf16 %v1404_v50, %v1403_v49  ;;  %v1427_v49 = vld [vmem:[#allocation5 + $0x370] sm:$0xff]  ;;  %v1428_v50 = vld [vmem:[#allocation5 + $0x378] sm:$0xff] }
 0x1f7   :  { %3053 = vmatpush3.bf16.msra.mxu1 %v3052_v51  ;;  %v1389_v51 = vld [vmem:[#allocation5 + $0x240] sm:$0xff] }
 0x1f8   :  { %3054 = vmatprep.subr.bf16.mxu1 %v3255_v20  ;;  %v3082_v56 = vpack.c.bf16 %v1390_v52, %v1389_v51  ;;  %v2021_v52 = vld [vmem:[%s3643_s6] ss:$0 sm:$0xff] }
 0x1f9   :  { %3032 = vmatpush3.bf16.msra.mxu0 %v3031_v54  ;;  %v1405_v54 = vld [vmem:[#allocation5 + $0x2c0] sm:$0xff] }
 0x1fa   :  { %3033 = vmatprep.subr.bf16.mxu0 %v3255_v20  ;;  %v3106_v15 = vpack.c.bf16 %v1406_v55, %v1405_v54  ;;  %v2022_v54 = vld [vmem:[%s3643_s6 + $0x1] ss:$0 sm:$0xff] }
 0x1fb   :  { %3056 = vmatpush3.bf16.msra.mxu1 %v3055_v57  ;;  %v1391_v57 = vld [vmem:[#allocation5 + $0x250] sm:$0xff] }
 0x1fc   :  { %3057 = vmatprep.subr.bf16.mxu1 %v3255_v20 }
 0x1fd   :  { %3035 = vmatpush3.bf16.msra.mxu0 %v3034_v59  ;;  %v2018_v59 = vld [vmem:[%s3641_s4 + $0x4] ss:$0 sm:$0xff] }
 0x1fe   :  { %v1026_v3 = vpop.f32.mrb[8].mxu1  ;;  %3036 = vmatprep.subr.bf16.mxu0 %v3255_v20 }
 0x1ff   :  { %v1027_v7 = vadd.f32 %v2016_v19, %v1026_v3  ;;  %v2419_v8 = vpop.f32.mrb[9].mxu1  ;;  %3059 = vmatpush3.bf16.msra.mxu1 %v3058_v62  ;;  %v3085_v62 = vpack.c.bf16 %v1392_v58, %v1391_v57 }
 0x200   :  { %v1096_v10 = vpop.f32.mrb[10].mxu0  ;;  %3060 = vmatprep.subr.bf16.mxu1 %v3255_v20  ;;  %v1410_v8 = vld [vmem:[#allocation5 + $0x2e8] sm:$0xff] }
 0x201   :  { %3167 = vtanh.f32 %v1027_v7  ;;  %3038 = vmatpush3.bf16.msra.mxu0 %v3037_v2  ;;  %v1097_v14 = vadd.f32 %v2017_v6, %v1096_v10  ;;  %v2454_v16 = vpop.f32.mrb[11].mxu0  ;;  %v2019_v2 = vld [vmem:[%s3641_s4 + $0x5] ss:$0 sm:$0xff] }
 0x202   :  { %3039 = vmatprep.subr.bf16.mxu0 %v3255_v20  ;;  %v1409_v7 = vld [vmem:[#allocation5 + $0x2e0] sm:$0xff]  ;;  %v1411_v16 = vld [vmem:[#allocation5 + $0x2f0] sm:$0xff] }
 0x203   :  { %3169 = vtanh.f32 %v1097_v14  ;;  %3062 = vmatpush3.bf16.msra.mxu1 %v3061_v9  ;;  %v3088_v9 = vpack.c.bf16 %v1394_v1, %v1393_v63  ;;  %v3112_v14 = vpack.c.bf16 %v1410_v8, %v1409_v7  ;;  %v3115_v23 = vpack.c.bf16 %v1412_v17, %v1411_v16 }
 0x204   :  { %3063 = vmatprep.subr.bf16.mxu1 %v3255_v20 }
 0x205   :  { %3041 = vmatpush3.bf16.msra.mxu0 %v3040_v13  ;;  %v1396_v13 = vld [vmem:[#allocation5 + $0x278] sm:$0xff] }
 0x206   :  { %3042 = vmatprep.subr.bf16.mxu0 %v3255_v20  ;;  %v3091_v18 = vpack.c.bf16 %v1396_v13, %v1395_v12 }
 0x207   :  { %3065 = vmatpush3.bf16.msra.mxu1 %v3064_v21  ;;  %v1413_v21 = vld [vmem:[#allocation5 + $0x300] sm:$0xff] }
 0x208   :  { %3066 = vmatprep.subr.bf16.mxu1 %v3255_v20 }
 0x209   :  { %3044 = vmatpush3.bf16.msra.mxu0 %v3043_v24  ;;  %v3118_v24 = vpack.c.bf16 %v1414_v22, %v1413_v21 }
 0x20a   :  { %3069 = vmatprep.subr.bf16.mxu0 %v3255_v20 }
 0x20b   :  { %v3168_v34 = vpop.eup %3167  ;;  %3068 = vmatpush3.bf16.msra.mxu1 %v3067_v28 }
 0x20c   :  { %2663 = vmatmul.mubr.f32.vlgmr.msra.gmra.mrb[16].mxu0 %v3168_v34  ;;  %3093 = vmatprep.subr.bf16.mxu1 %v3255_v20  ;;  %v1419_v34 = vld [vmem:[#allocation5 + $0x330] sm:$0xff] }
 0x20d   :  { %v3170_v38 = vpop.eup %3169  ;;  %3071 = vmatpush3.bf16.msra.mxu0 %v3070_v31  ;;  %2732 = vmatprep.mubr.msk.f32.mxu0 %vm3254_vm0, %v3253_v0  ;;  %v1417_v31 = vld [vmem:[#allocation5 + $0x320] sm:$0xff] }
 0x20e   :  { %3072 = vmatprep.subr.bf16.mxu0 %v3255_v20  ;;  %2698 = vmatmul.mubr.f32.vlgmr.msra.gmra.mrb[16].mxu1 %v3170_v38  ;;  %v3124_v33 = vpack.c.bf16 %v1418_v32, %v1417_v31  ;;  %v1422_v38 = vld [vmem:[#allocation5 + $0x348] sm:$0xff] }
 0x20f   :  { %3095 = vmatpush3.bf16.msra.mxu1 %v3094_v35  ;;  %2767 = vmatprep.mubr.msk.f32.mxu1 %vm3254_vm0, %v3253_v0  ;;  %v1420_v35 = vld [vmem:[#allocation5 + $0x338] sm:$0xff] }
 0x210   :  { %3096 = vmatprep.subr.bf16.mxu1 %v3255_v20  ;;  %v3127_v36 = vpack.c.bf16 %v1420_v35, %v1419_v34 }
 0x211   :  { %3074 = vmatpush3.bf16.msra.mxu0 %v3073_v39  ;;  %v3130_v39 = vpack.c.bf16 %v1422_v38, %v1421_v37 }
 0x212   :  { %3075 = vmatprep.subr.bf16.mxu0 %v3255_v20 }
 0x213   :  { %3098 = vmatpush3.bf16.msra.mxu1 %v3097_v42 }
 0x214   :  { %3099 = vmatprep.subr.bf16.mxu1 %v3255_v20 }
 0x215   :  { %3077 = vmatpush3.bf16.msra.mxu0 %v3076_v45  ;;  %v1426_v45 = vld [vmem:[#allocation5 + $0x368] sm:$0xff] }
 0x216   :  { %3078 = vmatprep.subr.bf16.mxu0 %v3255_v20 }
 0x217   :  { %3101 = vmatpush3.bf16.msra.mxu1 %v3100_v48  ;;  %v3136_v48 = vpack.c.bf16 %v1426_v45, %v1425_v44 }
 0x218   :  { %3102 = vmatprep.subr.bf16.mxu1 %v3255_v20 }
 0x219   :  { %3080 = vmatpush3.bf16.msra.mxu0 %v3079_v25  ;;  %v3139_v25 = vpack.c.bf16 %v1428_v50, %v1427_v49 }
 0x21a   :  { %3081 = vmatprep.subr.bf16.mxu0 %v3255_v20 }
 0x21b   :  { %3104 = vmatpush3.bf16.msra.mxu1 %v3103_v53 }
 0x21c   :  { %3105 = vmatprep.subr.bf16.mxu1 %v3255_v20 }
 0x21d   :  { %3083 = vmatpush3.bf16.msra.mxu0 %v3082_v56 }
 0x21e   :  { %v1166_v19 = vpop.f32.mrb[10].mxu1  ;;  %3084 = vmatprep.subr.bf16.mxu0 %v3255_v20 }
 0x21f   :  { %v1167_v3 = vadd.f32 %v2018_v59, %v1166_v19  ;;  %v2489_v4 = vpop.f32.mrb[11].mxu1  ;;  %3107 = vmatpush3.bf16.msra.mxu1 %v3106_v15 }
 0x220   :  { %v1236_v6 = vpop.f32.mrb[12].mxu0  ;;  %3108 = vmatprep.subr.bf16.mxu1 %v3255_v20  ;;  %v2026_v4 = vld [vmem:[%s3643_s6 + $0x5] ss:$0 sm:$0xff] }
 0x221   :  { %3171 = vtanh.f32 %v1167_v3  ;;  %3086 = vmatpush3.bf16.msra.mxu0 %v3085_v62  ;;  %v1237_v10 = vadd.f32 %v2019_v2, %v1236_v6  ;;  %v2524_v11 = vpop.f32.mrb[13].mxu0  ;;  %v2025_v2 = vld [vmem:[%s3643_s6 + $0x4] ss:$0 sm:$0xff] }
 0x222   :  { %3087 = vmatprep.subr.bf16.mxu0 %v3255_v20 }
 0x223   :  { %3173 = vtanh.f32 %v1237_v10  ;;  %3110 = vmatpush3.bf16.msra.mxu1 %v3109_v5  ;;  %v2027_v10 = vld [vmem:[%s3643_s6 + $0x6] ss:$0 sm:$0xff] }
 0x224   :  { %3111 = vmatprep.subr.bf16.mxu1 %v3255_v20 }
 0x225   :  { %3089 = vmatpush3.bf16.msra.mxu0 %v3088_v9 }
 0x226   :  { %3090 = vmatprep.subr.bf16.mxu0 %v3255_v20 }
 0x227   :  { %3113 = vmatpush3.bf16.msra.mxu1 %v3112_v14 }
 0x228   :  { %3114 = vmatprep.subr.bf16.mxu1 %v3255_v20 }
 0x229   :  { %3092 = vmatpush3.bf16.msra.mxu0 %v3091_v18 }
 0x22a   :  { %3117 = vmatprep.subr.bf16.mxu0 %v3255_v20 }
 0x22b   :  { %v3172_v28 = vpop.eup %3171  ;;  %3116 = vmatpush3.bf16.msra.mxu1 %v3115_v23 }
 0x22c   :  { %2733 = vmatmul.mubr.f32.vlgmr.msra.gmra.mrb[18].mxu0 %v3172_v28 }
 0x22d   :  { %v3174_v29 = vpop.eup %3173  ;;  %3119 = vmatpush3.bf16.msra.mxu0 %v3118_v24  ;;  %2802 = vmatprep.mubr.msk.f32.mxu0 %vm3254_vm0, %v3253_v0  ;;  %v1423_v0 = vld [vmem:[#allocation5 + $0x350] sm:$0xff] }
 0x22e   :  { %3120 = vmatprep.subr.bf16.mxu0 %v3255_v20  ;;  %2768 = vmatmul.mubr.f32.vlgmr.msra.gmra.mrb[18].mxu1 %v3174_v29  ;;  %v3133_v42 = vpack.c.bf16 %v1424_v40, %v1423_v0 }
 0x231   :  { %3122 = vmatpush3.bf16.msra.mxu0 %v3121_v30 }
 0x232   :  { %3123 = vmatprep.subr.bf16.mxu0 %v3255_v20 }
 0x235   :  { %3125 = vmatpush3.bf16.msra.mxu0 %v3124_v33 }
 0x236   :  { %3126 = vmatprep.subr.bf16.mxu0 %v3255_v20 }
 0x239   :  { %3128 = vmatpush3.bf16.msra.mxu0 %v3127_v36 }
 0x23a   :  { %3129 = vmatprep.subr.bf16.mxu0 %v3255_v20 }
 0x23d   :  { %3131 = vmatpush3.bf16.msra.mxu0 %v3130_v39 }
 0x23e   :  { %v1306_v43 = vpop.f32.mrb[12].mxu1  ;;  %3132 = vmatprep.subr.bf16.mxu0 %v3255_v20 }
 0x23f   :  { %v1307_v46 = vadd.f32 %v2020_v41, %v1306_v43  ;;  %v2559_v47 = vpop.f32.mrb[13].mxu1 }
 0x241   :  { %3175 = vtanh.f32 %v1307_v46  ;;  %3134 = vmatpush3.bf16.msra.mxu0 %v3133_v42 }
 0x242   :  { %3135 = vmatprep.subr.bf16.mxu0 %v3255_v20 }
 0x245   :  { %3137 = vmatpush3.bf16.msra.mxu0 %v3136_v48 }
 0x246   :  { %3138 = vmatprep.subr.bf16.mxu0 %v3255_v20  ;;  %v2023_v20 = vld [vmem:[%s3643_s6 + $0x2] ss:$0 sm:$0xff] }
 0x249   :  { %3140 = vmatpush3.bf16.msra.mxu0 %v3139_v25 }
 0x24b   :  { %v3176_v51 = vpop.eup %3175 }
 0x24c   :  { %2803 = vmatmul.mubr.f32.vlgmr.msra.gmra.mrb[20].mxu0 %v3176_v51 }
 0x2bf   :  { %v1544_v53 = vpop.f32.mrb[14].mxu0 }
 0x2c0   :  { %v1545_v55 = vadd.f32 %v2021_v52, %v1544_v53  ;;  %v2594_v56 = vpop.f32.mrb[15].mxu0 }
 0x2c1   :  { %v1614_v57 = vpop.f32.mrb[14].mxu1 }
 0x2c2   :  { %1968 = vst [vmem:[#allocation7] sm:$0xff] %v1545_v55  ;;  %v1615_v58 = vadd.f32 %v2022_v54, %v1614_v57  ;;  %v2629_v15 = vpop.f32.mrb[15].mxu1 }
 0x2c4   :  { %1969 = vst [vmem:[#allocation7 + $0x8] sm:$0xff] %v1615_v58 }
 0x2df   :  { %v1684_v59 = vpop.f32.mrb[16].mxu0 }
 0x2e0   :  { %v1685_v61 = vadd.f32 %v2023_v20, %v1684_v59  ;;  %v2664_v62 = vpop.f32.mrb[17].mxu0 }
 0x2e1   :  { %v1754_v19 = vpop.f32.mrb[16].mxu1 }
 0x2e2   :  { %1970 = vst [vmem:[#allocation7 + $0x10] sm:$0xff] %v1685_v61  ;;  %v1755_v63 = vadd.f32 %v2024_v60, %v1754_v19  ;;  %v2699_v1 = vpop.f32.mrb[17].mxu1 }
 0x2e4   :  { %1971 = vst [vmem:[#allocation7 + $0x18] sm:$0xff] %v1755_v63 }
 0x2ff   :  { %v1824_v3 = vpop.f32.mrb[18].mxu0 }
 0x300   :  { %v1825_v5 = vadd.f32 %v2025_v2, %v1824_v3  ;;  %v2734_v6 = vpop.f32.mrb[19].mxu0 }
 0x301   :  { %v1894_v7 = vpop.f32.mrb[18].mxu1 }
 0x302   :  { %1972 = vst [vmem:[#allocation7 + $0x20] sm:$0xff] %v1825_v5  ;;  %v1895_v8 = vadd.f32 %v2026_v4, %v1894_v7  ;;  %v2769_v9 = vpop.f32.mrb[19].mxu1 }
 0x304   :  { %1973 = vst [vmem:[#allocation7 + $0x28] sm:$0xff] %v1895_v8 }
 0x31f   :  { %v1964_v11 = vpop.f32.mrb[20].mxu0 }
 0x320   :  { %v1965_v12 = vadd.f32 %v2027_v10, %v1964_v11  ;;  %v2804_v13 = vpop.f32.mrb[21].mxu0 }
 0x322   :  { %1974 = vst [vmem:[#allocation7 + $0x30] sm:$0xff] %v1965_v12 }
 0x323   :  { %3232 = shalt.err (!%p3229_p6)
}
 0x324   :  { %s3233_s25 = scalar_lea.hbm %s3644_s7, 896 }
 0x325   :  { %p3234_p7 = scmp.ne.s32.totalorder %s3644_s7, %s3233_s25  ;;  %p3237_p8 = scmp.lt.u32.totalorder %s3233_s25, %s3644_s7 }
 0x327   :  { %p3239_p9 = pnand %p3237_p8, %p3234_p7 }
 0x329   :  { %3242 = shalt.err (!%p3239_p9)
}
 0x32a   :  { %1986 = dma.vmem_to_hbm [thread:$0]  %s1981_s22, 896, %s3644_s7, [#allocation4], %s3250_s11, %s3250_s11, %s3251_s12  }
 0x32b   :  { %3247 = dma.done.wait [#allocation4], 896  }
 0x32c   :  { %3248 = vsyncadd [#allocation4], 4294966400 }
 0x32d   :  { %1990 = vsyncpa [#allocation3], 1 }
 0x32e   :  { %1991 = vsyncpa [#allocation6], 1 }
 0x32f   :  { %1992 = vsyncpa [#allocation4], 1 }

</bundles_post_ra>
